<compile_context>
chip_gen: v5e
topology: v5e:2x2
jax: 0.10.0
libtpu: 0.0.40
codegen_flags: <defaults>
</compile_context>

<pallas_src>
import jax
import jax.numpy as jnp
import numpy as np
from jax.experimental import pallas as pl
from jax.experimental.pallas import tpu as pltpu

# ---- Decoder hyper-parameters (the `args` dict of the PyTorch module) -------
ENC   = 32          # lstm_encoder_size == d_model
NHEAD = 4           # n_head
HEAD  = ENC // NHEAD
DFF   = 2048        # nn.TransformerEncoderLayer default dim_feedforward
OUTL  = 8           # out_length (decoded sequence length)
BATCH = 2
LAT   = 3           # lat_length
LON   = 2           # lon_length
DIN   = ENC + LAT + LON
EPS   = 1e-5        # nn.LayerNorm default eps
OUT_PAD = 128       # lane-dense output width (5 useful lanes, rest zero padding)
NEG_INF = -1e30
# NOTE: self.activation, lat_linear, lon_linear are defined in __init__ but never
# used in forward(); dropout is identity at inference.


# ----------------------------- Pallas kernel ---------------------------------
def decoder_kernel(x_ref, lat_ref, lon_ref, rsel_ref, mask_ref,
                   wdec_ref, wlat_ref, wlon_ref, bfused_ref,   # fused dec_linear+QKV, split by input block
                   wo_ref, bo_ref,                             # MHA out projection
                   g1_ref, be1_ref,                            # LayerNorm 1
                   wf1_ref, bf1_ref,                           # FFN up   (32,2048) bf16
                   wf2t_ref, bf2_ref,                          # FFN down (2048,32) bf16 (pre-transposed)
                   g2_ref, be2_ref,                            # LayerNorm 2
                   wl_ref, bl_ref,                             # final projection, padded to 128 lanes
                   o_ref):                                     # (N, 128) f32
    N, D = x_ref.shape          # (L*B, ENC), seq-major rows: row = l*B + b

    # --- x-formation fused with dec_linear and the QKV in-projection ---------
    # fused = [xd | q | k | v]  where xd = dec_linear(cat(dec, lat, lon)).
    # lat/lon contribution is per batch element: computed at (B, 128) and
    # expanded to all N rows with the precomputed one-hot row selector (MXU).
    base = (jnp.dot(lat_ref[...], wlat_ref[...], preferred_element_type=jnp.float32)
            + jnp.dot(lon_ref[...], wlon_ref[...], preferred_element_type=jnp.float32)
            + bfused_ref[...])                                        # (B, 4*ENC)
    fused = (jnp.dot(x_ref[...], wdec_ref[...], preferred_element_type=jnp.float32)
             + jnp.dot(rsel_ref[...], base, preferred_element_type=jnp.float32))
    xd = fused[:, 0:D]                                                # residual stream (N, D)

    # --- multi-head self-attention: flat 2-D per-head matmuls ----------------
    # Scores are (N, N) with an additive block-diagonal mask so rows of
    # different batch elements never attend to each other; the head-concat is
    # folded into the output projection via per-head row slices of Wo.
    scale = 1.0 / float(HEAD) ** 0.5
    mask = mask_ref[...]                                              # (N, N), 0 / -1e30
    attn = jnp.zeros((N, D), jnp.float32)
    for h in range(NHEAD):
        qo, ko, vo = D + h * HEAD, 2 * D + h * HEAD, 3 * D + h * HEAD
        qh = fused[:, qo:qo + HEAD] * scale                           # (N, HEAD)
        kh = fused[:, ko:ko + HEAD]
        vh = fused[:, vo:vo + HEAD]
        s = jax.lax.dot_general(qh, kh, (((1,), (1,)), ((), ())),
                                preferred_element_type=jnp.float32) + mask   # (N, N)
        s = s - jnp.max(s, axis=-1, keepdims=True)
        p = jnp.exp(s)                                                # masked cols underflow to 0
        p = p * pl.reciprocal(jnp.sum(p, axis=-1, keepdims=True), approx=True)
        oh = jnp.dot(p, vh, preferred_element_type=jnp.float32)       # (N, HEAD)
        attn = attn + jnp.dot(oh, wo_ref[h * HEAD:(h + 1) * HEAD, :],
                              preferred_element_type=jnp.float32)
    attn = attn + bo_ref[...]

    # --- residual + LayerNorm 1 (post-norm) -----------------------------------
    y = xd + attn
    mu = jnp.mean(y, axis=-1, keepdims=True)
    var = jnp.mean(jnp.square(y - mu), axis=-1, keepdims=True)
    y = (y - mu) * jax.lax.rsqrt(var + EPS) * g1_ref[...] + be1_ref[...]

    # --- feed-forward (ReLU): bf16 weights on the MXU, f32 accumulation -------
    ff = jnp.dot(y.astype(jnp.bfloat16), wf1_ref[...],
                 preferred_element_type=jnp.float32) + bf1_ref[...]
    ff = jnp.maximum(ff, 0.0)
    ff = jnp.dot(ff.astype(jnp.bfloat16), wf2t_ref[...],
                 preferred_element_type=jnp.float32) + bf2_ref[...]

    # --- residual + LayerNorm 2 ------------------------------------------------
    z = y + ff
    mu = jnp.mean(z, axis=-1, keepdims=True)
    var = jnp.mean(jnp.square(z - mu), axis=-1, keepdims=True)
    z = (z - mu) * jax.lax.rsqrt(var + EPS) * g2_ref[...] + be2_ref[...]

    # --- final linear1 (ENC -> 5, zero-padded to 128 lanes) + outputActivation -
    out = jnp.dot(z, wl_ref[...], preferred_element_type=jnp.float32) + bl_ref[...]
    lane = jax.lax.broadcasted_iota(jnp.int32, out.shape, 1)
    # exp/tanh intentionally also run on the zero padding lanes (>=5); they are
    # sliced away in the wrapper -- do NOT "fix" this into slice+concat.
    o_ref[...] = jnp.where(lane < 2, out,
                           jnp.where(lane < 4, jnp.exp(out), jnp.tanh(out)))


# -------------------- one-time parameter preparation --------------------------
def prepare_params(p):
    """Fold dec_linear into the QKV in-projection, split the fused weight by
    input block (dec/lat/lon), pre-transpose, pad the final projection to 128
    lanes, and cast FFN weights to bf16.  Done ONCE at load time."""
    A = p['dec_w'].T.astype(jnp.float32)                   # (DIN, ENC)
    Bm = p['inproj_w'].T.astype(jnp.float32)               # (ENC, 3*ENC)
    w_fused = jnp.concatenate([A, A @ Bm], axis=1)         # (DIN, 4*ENC) -> 128 lanes
    b_fused = jnp.concatenate([p['dec_b'], p['dec_b'] @ Bm + p['inproj_b']])

    wl = jnp.zeros((ENC, OUT_PAD), jnp.float32).at[:, :5].set(p['l1_w'].T)
    bl = jnp.zeros((1, OUT_PAD), jnp.float32).at[:, :5].set(p['l1_b'])

    r1 = lambda a: a.reshape(1, -1).astype(jnp.float32)
    return {
        'w_dec': w_fused[:ENC],                            # (32, 128)
        'w_lat': w_fused[ENC:ENC + LAT],                   # (3, 128)
        'w_lon': w_fused[ENC + LAT:ENC + LAT + LON],       # (2, 128)
        'b_fused': r1(b_fused),
        'wo': p['outproj_w'].T.astype(jnp.float32), 'bo': r1(p['outproj_b']),
        'g1': r1(p['ln1_g']), 'be1': r1(p['ln1_b']),
        'wf1': p['ff1_w'].T.astype(jnp.bfloat16),          # (32, 2048) bf16, lane-dense
        'bf1': r1(p['ff1_b']),
        'wf2t': p['ff2_w'].T.astype(jnp.bfloat16),         # (2048, 32) bf16, plain "nn" MXU
        'bf2': r1(p['ff2_b']),
        'g2': r1(p['ln2_g']), 'be2': r1(p['ln2_b']),
        'wl': wl, 'bl': bl,                                # lane-dense final projection
    }


# ------------------------------ wrapper ---------------------------------------
@jax.jit
def decoder_forward(dec, lat_enc, lon_enc, pp):
    """dec: (L, B, ENC) seq-first; lat_enc: (B, LAT); lon_enc: (B, LON).
    Returns (L, B, 5) -- matching the PyTorch Decoder output convention."""
    L, B, E = dec.shape
    N = L * B
    G = 1   # "stack" axis: number of independent forwards fused into one call.
            # Weights are DMA'd once (block index pinned at 0) and stay
            # VMEM-resident across the grid; mark it "parallel" for v7x 2-TC.

    # seq-major flat rows (row = l*B + b): pure bitcast reshapes, no transposes.
    x = dec.reshape(G, N, E).astype(jnp.float32)
    lat = lat_enc.reshape(G, B, LAT).astype(jnp.float32)
    lon = lon_enc.reshape(G, B, LON).astype(jnp.float32)

    # Compile-time constants (depend only on static shapes): one-hot row->batch
    # selector and additive block-diagonal attention mask.  Built with numpy so
    # they cost nothing at runtime.
    rows = np.arange(N)
    rsel = jnp.asarray((rows[:, None] % B == np.arange(B)[None, :]).astype(np.float32))
    mask = jnp.asarray(np.where(rows[:, None] % B == rows[None, :] % B,
                                0.0, NEG_INF).astype(np.float32))

    weights = (pp['w_dec'], pp['w_lat'], pp['w_lon'], pp['b_fused'],
               pp['wo'], pp['bo'], pp['g1'], pp['be1'],
               pp['wf1'], pp['bf1'], pp['wf2t'], pp['bf2'],
               pp['g2'], pp['be2'], pp['wl'], pp['bl'])

    per_stack = lambda shape: pl.BlockSpec(shape, lambda g: (g, 0, 0))
    pinned = lambda a: pl.BlockSpec(a.shape, lambda g: (0, 0))   # weight stays resident

    out = pl.pallas_call(
        decoder_kernel,
        out_shape=jax.ShapeDtypeStruct((G, N, OUT_PAD), jnp.float32),
        grid=(G,),
        in_specs=[per_stack((None, N, E)),
                  per_stack((None, B, LAT)),
                  per_stack((None, B, LON)),
                  pinned(rsel), pinned(mask)]
                 + [pinned(w) for w in weights],
        out_specs=per_stack((None, N, OUT_PAD)),
        compiler_params=pltpu.CompilerParams(
            dimension_semantics=("parallel",)),
    )(x, lat, lon, rsel, mask, *weights)

    # lane-dense (N, 128) store in the kernel; slice the 5 useful channels here.
    return out[0, :, :5].reshape(L, B, 5)


# -------------------------- pure-JAX reference ---------------------------------
def ref_forward(dec, lat_enc, lon_enc, p):
    L, B, _ = dec.shape
    lat_r = jnp.transpose(jnp.broadcast_to(lat_enc[:, None, :], (B, L, LAT)), (1, 0, 2))
    lon_r = jnp.transpose(jnp.broadcast_to(lon_enc[:, None, :], (B, L, LON)), (1, 0, 2))
    x = jnp.concatenate([dec, lat_r, lon_r], axis=-1)
    x = x @ p['dec_w'].T + p['dec_b']

    qkv = x @ p['inproj_w'].T + p['inproj_b']
    q, k, v = jnp.split(qkv, 3, axis=-1)
    sh = lambda t: t.reshape(L, B, NHEAD, HEAD)
    qh, kh, vh = sh(q), sh(k), sh(v)
    s = jnp.einsum('lbhd,mbhd->bhlm', qh * (HEAD ** -0.5), kh)
    pm = jax.nn.softmax(s, axis=-1)
    a = jnp.einsum('bhlm,mbhd->lbhd', pm, vh).reshape(L, B, ENC)
    a = a @ p['outproj_w'].T + p['outproj_b']

    def ln(t, g, b):
        mu = jnp.mean(t, -1, keepdims=True)
        var = jnp.mean(jnp.square(t - mu), -1, keepdims=True)
        return (t - mu) * jax.lax.rsqrt(var + EPS) * g + b

    y = ln(x + a, p['ln1_g'], p['ln1_b'])
    ff = jax.nn.relu(y @ p['ff1_w'].T + p['ff1_b']) @ p['ff2_w'].T + p['ff2_b']
    z = ln(y + ff, p['ln2_g'], p['ln2_b'])
    o = z @ p['l1_w'].T + p['l1_b']
    return jnp.concatenate([o[..., 0:2], jnp.exp(o[..., 2:4]), jnp.tanh(o[..., 4:5])], -1)


# ----------------------------- parameter init ----------------------------------
def init_params(key):
    ks = jax.random.split(key, 12)
    w = lambda k, shape: (jax.random.normal(k, shape, jnp.float32)
                          / jnp.sqrt(jnp.float32(shape[-1])))
    b = lambda k, n: 0.01 * jax.random.normal(k, (n,), jnp.float32)
    return {
        # PyTorch layouts: nn.Linear weight is (out_features, in_features)
        'dec_w': w(ks[0], (ENC, DIN)),        'dec_b': b(ks[0], ENC),
        'inproj_w': w(ks[1], (3 * ENC, ENC)), 'inproj_b': b(ks[1], 3 * ENC),
        'outproj_w': w(ks[2], (ENC, ENC)),    'outproj_b': b(ks[2], ENC),
        'ln1_g': 1.0 + 0.05 * jax.random.normal(ks[3], (ENC,), jnp.float32),
        'ln1_b': 0.05 * jax.random.normal(ks[4], (ENC,), jnp.float32),
        'ff1_w': w(ks[5], (DFF, ENC)),        'ff1_b': b(ks[5], DFF),
        'ff2_w': w(ks[6], (ENC, DFF)),        'ff2_b': b(ks[6], ENC),
        'ln2_g': 1.0 + 0.05 * jax.random.normal(ks[7], (ENC,), jnp.float32),
        'ln2_b': 0.05 * jax.random.normal(ks[8], (ENC,), jnp.float32),
        'l1_w': w(ks[9], (5, ENC)),           'l1_b': b(ks[9], 5),
    }


if __name__ == "__main__":
    key = jax.random.PRNGKey(0)
    k_dec, k_lat, k_lon, k_par = jax.random.split(key, 4)

    dec = jax.random.normal(k_dec, (OUTL, BATCH, ENC), jnp.float32)
    lat_enc = jax.nn.softmax(jax.random.normal(k_lat, (BATCH, LAT), jnp.float32), -1)
    lon_enc = jax.nn.softmax(jax.random.normal(k_lon, (BATCH, LON), jnp.float32), -1)
    params = init_params(k_par)

    prepped = jax.tree_util.tree_map(jax.block_until_ready, prepare_params(params))

    out = jax.block_until_ready(decoder_forward(dec, lat_enc, lon_enc, prepped))
    ref = jax.block_until_ready(ref_forward(dec, lat_enc, lon_enc, params))

    assert out.shape == (OUTL, BATCH, 5), out.shape
    # tolerance accounts for bf16 FFN weights, approx reciprocal in softmax and
    # the algebraic dec_linear->QKV fusion; reference is pure f32.
    np.testing.assert_allclose(np.asarray(out), np.asarray(ref), rtol=2e-2, atol=2e-2)
    print("KERNEL_OK")
</pallas_src>

<mosaic_0001>
module attributes {stable_mosaic.version = 11 : i64} {
  func.func @decoder_kernel(%arg0: i32, %arg1: memref<1x16x32xf32, #tpu.memory_space<vmem>>, %arg2: memref<1x2x3xf32, #tpu.memory_space<vmem>>, %arg3: memref<1x2x2xf32, #tpu.memory_space<vmem>>, %arg4: memref<16x2xf32, #tpu.memory_space<vmem>>, %arg5: memref<16x16xf32, #tpu.memory_space<vmem>>, %arg6: memref<32x128xf32, #tpu.memory_space<vmem>>, %arg7: memref<3x128xf32, #tpu.memory_space<vmem>>, %arg8: memref<2x128xf32, #tpu.memory_space<vmem>>, %arg9: memref<1x128xf32, #tpu.memory_space<vmem>>, %arg10: memref<32x32xf32, #tpu.memory_space<vmem>>, %arg11: memref<1x32xf32, #tpu.memory_space<vmem>>, %arg12: memref<1x32xf32, #tpu.memory_space<vmem>>, %arg13: memref<1x32xf32, #tpu.memory_space<vmem>>, %arg14: memref<32x2048xbf16, #tpu.memory_space<vmem>>, %arg15: memref<1x2048xf32, #tpu.memory_space<vmem>>, %arg16: memref<2048x32xbf16, #tpu.memory_space<vmem>>, %arg17: memref<1x32xf32, #tpu.memory_space<vmem>>, %arg18: memref<1x32xf32, #tpu.memory_space<vmem>>, %arg19: memref<1x32xf32, #tpu.memory_space<vmem>>, %arg20: memref<32x128xf32, #tpu.memory_space<vmem>>, %arg21: memref<1x128xf32, #tpu.memory_space<vmem>>, %arg22: memref<1x16x128xf32, #tpu.memory_space<vmem>>) attributes {dimension_semantics = [#tpu.dimension_semantics<parallel>], iteration_bounds = array<i64: 1>, scalar_prefetch = 0 : i64, scratch_operands = 0 : i64, tpu.core_type = #tpu.core_type<tc>, window_params = [{transform_indices = @transform_0, window_bounds = array<i64: 1, 16, 32>}, {transform_indices = @transform_1, window_bounds = array<i64: 1, 2, 3>}, {transform_indices = @transform_2, window_bounds = array<i64: 1, 2, 2>}, {pipeline_mode = #tpu.pipeline_mode<synchronous>, transform_indices = @transform_3, window_bounds = array<i64: 16, 2>}, {pipeline_mode = #tpu.pipeline_mode<synchronous>, transform_indices = @transform_4, window_bounds = array<i64: 16, 16>}, {pipeline_mode = #tpu.pipeline_mode<synchronous>, transform_indices = @transform_5, window_bounds = array<i64: 32, 128>}, {pipeline_mode = #tpu.pipeline_mode<synchronous>, transform_indices = @transform_6, window_bounds = array<i64: 3, 128>}, {pipeline_mode = #tpu.pipeline_mode<synchronous>, transform_indices = @transform_7, window_bounds = array<i64: 2, 128>}, {pipeline_mode = #tpu.pipeline_mode<synchronous>, transform_indices = @transform_8, window_bounds = array<i64: 1, 128>}, {pipeline_mode = #tpu.pipeline_mode<synchronous>, transform_indices = @transform_9, window_bounds = array<i64: 32, 32>}, {pipeline_mode = #tpu.pipeline_mode<synchronous>, transform_indices = @transform_10, window_bounds = array<i64: 1, 32>}, {pipeline_mode = #tpu.pipeline_mode<synchronous>, transform_indices = @transform_11, window_bounds = array<i64: 1, 32>}, {pipeline_mode = #tpu.pipeline_mode<synchronous>, transform_indices = @transform_12, window_bounds = array<i64: 1, 32>}, {pipeline_mode = #tpu.pipeline_mode<synchronous>, transform_indices = @transform_13, window_bounds = array<i64: 32, 2048>}, {pipeline_mode = #tpu.pipeline_mode<synchronous>, transform_indices = @transform_14, window_bounds = array<i64: 1, 2048>}, {pipeline_mode = #tpu.pipeline_mode<synchronous>, transform_indices = @transform_15, window_bounds = array<i64: 2048, 32>}, {pipeline_mode = #tpu.pipeline_mode<synchronous>, transform_indices = @transform_16, window_bounds = array<i64: 1, 32>}, {pipeline_mode = #tpu.pipeline_mode<synchronous>, transform_indices = @transform_17, window_bounds = array<i64: 1, 32>}, {pipeline_mode = #tpu.pipeline_mode<synchronous>, transform_indices = @transform_18, window_bounds = array<i64: 1, 32>}, {pipeline_mode = #tpu.pipeline_mode<synchronous>, transform_indices = @transform_19, window_bounds = array<i64: 32, 128>}, {pipeline_mode = #tpu.pipeline_mode<synchronous>, transform_indices = @transform_20, window_bounds = array<i64: 1, 128>}, {transform_indices = @transform_21, window_bounds = array<i64: 1, 16, 128>}]} {
    %c0 = arith.constant 0 : index
    %c0_0 = arith.constant 0 : index
    %c0_1 = arith.constant 0 : index
    %0 = vector.load %arg2[%c0, %c0_0, %c0_1] : memref<1x2x3xf32, #tpu.memory_space<vmem>>, vector<1x2x3xf32>
    %1 = vector.shape_cast %0 : vector<1x2x3xf32> to vector<2x3xf32>
    %c0_2 = arith.constant 0 : index
    %c0_3 = arith.constant 0 : index
    %2 = vector.load %arg7[%c0_2, %c0_3] : memref<3x128xf32, #tpu.memory_space<vmem>>, vector<3x128xf32>
    %cst = arith.constant dense<0.000000e+00> : vector<2x128xf32>
    %3 = tpu.matmul %1, %2, %cst {dimension_numbers = #tpu.dot_dimension_numbers<[1], [0], [0], [1], [0, 0, 1, 1], [], []>} : vector<2x3xf32>, vector<3x128xf32>, vector<2x128xf32> -> vector<2x128xf32>
    %c0_4 = arith.constant 0 : index
    %c0_5 = arith.constant 0 : index
    %c0_6 = arith.constant 0 : index
    %4 = vector.load %arg3[%c0_4, %c0_5, %c0_6] : memref<1x2x2xf32, #tpu.memory_space<vmem>>, vector<1x2x2xf32>
    %5 = vector.shape_cast %4 : vector<1x2x2xf32> to vector<2x2xf32>
    %c0_7 = arith.constant 0 : index
    %c0_8 = arith.constant 0 : index
    %6 = vector.load %arg8[%c0_7, %c0_8] : memref<2x128xf32, #tpu.memory_space<vmem>>, vector<2x128xf32>
    %cst_9 = arith.constant dense<0.000000e+00> : vector<2x128xf32>
    %7 = tpu.matmul %5, %6, %cst_9 {dimension_numbers = #tpu.dot_dimension_numbers<[1], [0], [0], [1], [0, 0, 1, 1], [], []>} : vector<2x2xf32>, vector<2x128xf32>, vector<2x128xf32> -> vector<2x128xf32>
    %8 = arith.addf %3, %7 : vector<2x128xf32>
    %c0_10 = arith.constant 0 : index
    %c0_11 = arith.constant 0 : index
    %9 = vector.load %arg9[%c0_10, %c0_11] : memref<1x128xf32, #tpu.memory_space<vmem>>, vector<1x128xf32>
    %10 = vector.broadcast %9 : vector<1x128xf32> to vector<2x128xf32>
    %11 = arith.addf %8, %10 : vector<2x128xf32>
    %c0_12 = arith.constant 0 : index
    %c0_13 = arith.constant 0 : index
    %c0_14 = arith.constant 0 : index
    %12 = vector.load %arg1[%c0_12, %c0_13, %c0_14] : memref<1x16x32xf32, #tpu.memory_space<vmem>>, vector<1x16x32xf32>
    %13 = vector.shape_cast %12 : vector<1x16x32xf32> to vector<16x32xf32>
    %c0_15 = arith.constant 0 : index
    %c0_16 = arith.constant 0 : index
    %14 = vector.load %arg6[%c0_15, %c0_16] : memref<32x128xf32, #tpu.memory_space<vmem>>, vector<32x128xf32>
    %cst_17 = arith.constant dense<0.000000e+00> : vector<16x128xf32>
    %15 = tpu.matmul %13, %14, %cst_17 {dimension_numbers = #tpu.dot_dimension_numbers<[1], [0], [0], [1], [0, 0, 1, 1], [], []>} : vector<16x32xf32>, vector<32x128xf32>, vector<16x128xf32> -> vector<16x128xf32>
    %c0_18 = arith.constant 0 : index
    %c0_19 = arith.constant 0 : index
    %16 = vector.load %arg4[%c0_18, %c0_19] : memref<16x2xf32, #tpu.memory_space<vmem>>, vector<16x2xf32>
    %cst_20 = arith.constant dense<0.000000e+00> : vector<16x128xf32>
    %17 = tpu.matmul %16, %11, %cst_20 {dimension_numbers = #tpu.dot_dimension_numbers<[1], [0], [0], [1], [0, 0, 1, 1], [], []>} : vector<16x2xf32>, vector<2x128xf32>, vector<16x128xf32> -> vector<16x128xf32>
    %18 = arith.addf %15, %17 : vector<16x128xf32>
    %19 = vector.extract_strided_slice %18 {offsets = [0, 0], sizes = [16, 32], strides = [1, 1]} : vector<16x128xf32> to vector<16x32xf32>
    %c0_21 = arith.constant 0 : index
    %c0_22 = arith.constant 0 : index
    %20 = vector.load %arg5[%c0_21, %c0_22] : memref<16x16xf32, #tpu.memory_space<vmem>>, vector<16x16xf32>
    %cst_23 = arith.constant 0.000000e+00 : f32
    %21 = vector.broadcast %cst_23 : f32 to vector<16x32xf32>
    %22 = vector.extract_strided_slice %18 {offsets = [0, 32], sizes = [16, 8], strides = [1, 1]} : vector<16x128xf32> to vector<16x8xf32>
    %cst_24 = arith.constant 0.353553385 : f32
    %23 = vector.broadcast %cst_24 : f32 to vector<16x8xf32>
    %24 = arith.mulf %22, %23 : vector<16x8xf32>
    %25 = vector.extract_strided_slice %18 {offsets = [0, 64], sizes = [16, 8], strides = [1, 1]} : vector<16x128xf32> to vector<16x8xf32>
    %26 = vector.extract_strided_slice %18 {offsets = [0, 96], sizes = [16, 8], strides = [1, 1]} : vector<16x128xf32> to vector<16x8xf32>
    %cst_25 = arith.constant dense<0.000000e+00> : vector<16x16xf32>
    %27 = tpu.matmul %24, %25, %cst_25 {dimension_numbers = #tpu.dot_dimension_numbers<[1], [1], [0], [0], [0, 0, 1, 0], [], []>} : vector<16x8xf32>, vector<16x8xf32>, vector<16x16xf32> -> vector<16x16xf32>
    %28 = arith.addf %27, %20 : vector<16x16xf32>
    %cst_26 = arith.constant dense<0xFF800000> : vector<16xf32>
    %29 = vector.multi_reduction <maximumf>, %28, %cst_26 [1] : vector<16x16xf32> to vector<16xf32>
    %30 = vector.shape_cast %29 : vector<16xf32> to vector<16x1xf32>
    %31 = vector.broadcast %30 : vector<16x1xf32> to vector<16x16xf32>
    %32 = arith.subf %28, %31 : vector<16x16xf32>
    %33 = math.exp %32 : vector<16x16xf32>
    %cst_27 = arith.constant dense<0.000000e+00> : vector<16xf32>
    %34 = vector.multi_reduction <add>, %33, %cst_27 [1] : vector<16x16xf32> to vector<16xf32>
    %35 = vector.shape_cast %34 : vector<16xf32> to vector<16x1xf32>
    %36 = tpu.reciprocal %35 {approx = true} : vector<16x1xf32> -> vector<16x1xf32>
    %37 = vector.broadcast %36 : vector<16x1xf32> to vector<16x16xf32>
    %38 = arith.mulf %33, %37 : vector<16x16xf32>
    %cst_28 = arith.constant dense<0.000000e+00> : vector<16x8xf32>
    %39 = tpu.matmul %38, %26, %cst_28 {dimension_numbers = #tpu.dot_dimension_numbers<[1], [0], [0], [1], [0, 0, 1, 1], [], []>} : vector<16x16xf32>, vector<16x8xf32>, vector<16x8xf32> -> vector<16x8xf32>
    %c0_29 = arith.constant 0 : index
    %c0_30 = arith.constant 0 : index
    %40 = vector.load %arg10[%c0_29, %c0_30] : memref<32x32xf32, #tpu.memory_space<vmem>>, vector<8x32xf32>
    %cst_31 = arith.constant dense<0.000000e+00> : vector<16x32xf32>
    %41 = tpu.matmul %39, %40, %cst_31 {dimension_numbers = #tpu.dot_dimension_numbers<[1], [0], [0], [1], [0, 0, 1, 1], [], []>} : vector<16x8xf32>, vector<8x32xf32>, vector<16x32xf32> -> vector<16x32xf32>
    %42 = arith.addf %21, %41 : vector<16x32xf32>
    %43 = vector.extract_strided_slice %18 {offsets = [0, 40], sizes = [16, 8], strides = [1, 1]} : vector<16x128xf32> to vector<16x8xf32>
    %cst_32 = arith.constant 0.353553385 : f32
    %44 = vector.broadcast %cst_32 : f32 to vector<16x8xf32>
    %45 = arith.mulf %43, %44 : vector<16x8xf32>
    %46 = vector.extract_strided_slice %18 {offsets = [0, 72], sizes = [16, 8], strides = [1, 1]} : vector<16x128xf32> to vector<16x8xf32>
    %47 = vector.extract_strided_slice %18 {offsets = [0, 104], sizes = [16, 8], strides = [1, 1]} : vector<16x128xf32> to vector<16x8xf32>
    %cst_33 = arith.constant dense<0.000000e+00> : vector<16x16xf32>
    %48 = tpu.matmul %45, %46, %cst_33 {dimension_numbers = #tpu.dot_dimension_numbers<[1], [1], [0], [0], [0, 0, 1, 0], [], []>} : vector<16x8xf32>, vector<16x8xf32>, vector<16x16xf32> -> vector<16x16xf32>
    %49 = arith.addf %48, %20 : vector<16x16xf32>
    %cst_34 = arith.constant dense<0xFF800000> : vector<16xf32>
    %50 = vector.multi_reduction <maximumf>, %49, %cst_34 [1] : vector<16x16xf32> to vector<16xf32>
    %51 = vector.shape_cast %50 : vector<16xf32> to vector<16x1xf32>
    %52 = vector.broadcast %51 : vector<16x1xf32> to vector<16x16xf32>
    %53 = arith.subf %49, %52 : vector<16x16xf32>
    %54 = math.exp %53 : vector<16x16xf32>
    %cst_35 = arith.constant dense<0.000000e+00> : vector<16xf32>
    %55 = vector.multi_reduction <add>, %54, %cst_35 [1] : vector<16x16xf32> to vector<16xf32>
    %56 = vector.shape_cast %55 : vector<16xf32> to vector<16x1xf32>
    %57 = tpu.reciprocal %56 {approx = true} : vector<16x1xf32> -> vector<16x1xf32>
    %58 = vector.broadcast %57 : vector<16x1xf32> to vector<16x16xf32>
    %59 = arith.mulf %54, %58 : vector<16x16xf32>
    %cst_36 = arith.constant dense<0.000000e+00> : vector<16x8xf32>
    %60 = tpu.matmul %59, %47, %cst_36 {dimension_numbers = #tpu.dot_dimension_numbers<[1], [0], [0], [1], [0, 0, 1, 1], [], []>} : vector<16x16xf32>, vector<16x8xf32>, vector<16x8xf32> -> vector<16x8xf32>
    %c8 = arith.constant 8 : index
    %c0_37 = arith.constant 0 : index
    %61 = vector.load %arg10[%c8, %c0_37] : memref<32x32xf32, #tpu.memory_space<vmem>>, vector<8x32xf32>
    %cst_38 = arith.constant dense<0.000000e+00> : vector<16x32xf32>
    %62 = tpu.matmul %60, %61, %cst_38 {dimension_numbers = #tpu.dot_dimension_numbers<[1], [0], [0], [1], [0, 0, 1, 1], [], []>} : vector<16x8xf32>, vector<8x32xf32>, vector<16x32xf32> -> vector<16x32xf32>
    %63 = arith.addf %42, %62 : vector<16x32xf32>
    %64 = vector.extract_strided_slice %18 {offsets = [0, 48], sizes = [16, 8], strides = [1, 1]} : vector<16x128xf32> to vector<16x8xf32>
    %cst_39 = arith.constant 0.353553385 : f32
    %65 = vector.broadcast %cst_39 : f32 to vector<16x8xf32>
    %66 = arith.mulf %64, %65 : vector<16x8xf32>
    %67 = vector.extract_strided_slice %18 {offsets = [0, 80], sizes = [16, 8], strides = [1, 1]} : vector<16x128xf32> to vector<16x8xf32>
    %68 = vector.extract_strided_slice %18 {offsets = [0, 112], sizes = [16, 8], strides = [1, 1]} : vector<16x128xf32> to vector<16x8xf32>
    %cst_40 = arith.constant dense<0.000000e+00> : vector<16x16xf32>
    %69 = tpu.matmul %66, %67, %cst_40 {dimension_numbers = #tpu.dot_dimension_numbers<[1], [1], [0], [0], [0, 0, 1, 0], [], []>} : vector<16x8xf32>, vector<16x8xf32>, vector<16x16xf32> -> vector<16x16xf32>
    %70 = arith.addf %69, %20 : vector<16x16xf32>
    %cst_41 = arith.constant dense<0xFF800000> : vector<16xf32>
    %71 = vector.multi_reduction <maximumf>, %70, %cst_41 [1] : vector<16x16xf32> to vector<16xf32>
    %72 = vector.shape_cast %71 : vector<16xf32> to vector<16x1xf32>
    %73 = vector.broadcast %72 : vector<16x1xf32> to vector<16x16xf32>
    %74 = arith.subf %70, %73 : vector<16x16xf32>
    %75 = math.exp %74 : vector<16x16xf32>
    %cst_42 = arith.constant dense<0.000000e+00> : vector<16xf32>
    %76 = vector.multi_reduction <add>, %75, %cst_42 [1] : vector<16x16xf32> to vector<16xf32>
    %77 = vector.shape_cast %76 : vector<16xf32> to vector<16x1xf32>
    %78 = tpu.reciprocal %77 {approx = true} : vector<16x1xf32> -> vector<16x1xf32>
    %79 = vector.broadcast %78 : vector<16x1xf32> to vector<16x16xf32>
    %80 = arith.mulf %75, %79 : vector<16x16xf32>
    %cst_43 = arith.constant dense<0.000000e+00> : vector<16x8xf32>
    %81 = tpu.matmul %80, %68, %cst_43 {dimension_numbers = #tpu.dot_dimension_numbers<[1], [0], [0], [1], [0, 0, 1, 1], [], []>} : vector<16x16xf32>, vector<16x8xf32>, vector<16x8xf32> -> vector<16x8xf32>
    %c16 = arith.constant 16 : index
    %c0_44 = arith.constant 0 : index
    %82 = vector.load %arg10[%c16, %c0_44] : memref<32x32xf32, #tpu.memory_space<vmem>>, vector<8x32xf32>
    %cst_45 = arith.constant dense<0.000000e+00> : vector<16x32xf32>
    %83 = tpu.matmul %81, %82, %cst_45 {dimension_numbers = #tpu.dot_dimension_numbers<[1], [0], [0], [1], [0, 0, 1, 1], [], []>} : vector<16x8xf32>, vector<8x32xf32>, vector<16x32xf32> -> vector<16x32xf32>
    %84 = arith.addf %63, %83 : vector<16x32xf32>
    %85 = vector.extract_strided_slice %18 {offsets = [0, 56], sizes = [16, 8], strides = [1, 1]} : vector<16x128xf32> to vector<16x8xf32>
    %cst_46 = arith.constant 0.353553385 : f32
    %86 = vector.broadcast %cst_46 : f32 to vector<16x8xf32>
    %87 = arith.mulf %85, %86 : vector<16x8xf32>
    %88 = vector.extract_strided_slice %18 {offsets = [0, 88], sizes = [16, 8], strides = [1, 1]} : vector<16x128xf32> to vector<16x8xf32>
    %89 = vector.extract_strided_slice %18 {offsets = [0, 120], sizes = [16, 8], strides = [1, 1]} : vector<16x128xf32> to vector<16x8xf32>
    %cst_47 = arith.constant dense<0.000000e+00> : vector<16x16xf32>
    %90 = tpu.matmul %87, %88, %cst_47 {dimension_numbers = #tpu.dot_dimension_numbers<[1], [1], [0], [0], [0, 0, 1, 0], [], []>} : vector<16x8xf32>, vector<16x8xf32>, vector<16x16xf32> -> vector<16x16xf32>
    %91 = arith.addf %90, %20 : vector<16x16xf32>
    %cst_48 = arith.constant dense<0xFF800000> : vector<16xf32>
    %92 = vector.multi_reduction <maximumf>, %91, %cst_48 [1] : vector<16x16xf32> to vector<16xf32>
    %93 = vector.shape_cast %92 : vector<16xf32> to vector<16x1xf32>
    %94 = vector.broadcast %93 : vector<16x1xf32> to vector<16x16xf32>
    %95 = arith.subf %91, %94 : vector<16x16xf32>
    %96 = math.exp %95 : vector<16x16xf32>
    %cst_49 = arith.constant dense<0.000000e+00> : vector<16xf32>
    %97 = vector.multi_reduction <add>, %96, %cst_49 [1] : vector<16x16xf32> to vector<16xf32>
    %98 = vector.shape_cast %97 : vector<16xf32> to vector<16x1xf32>
    %99 = tpu.reciprocal %98 {approx = true} : vector<16x1xf32> -> vector<16x1xf32>
    %100 = vector.broadcast %99 : vector<16x1xf32> to vector<16x16xf32>
    %101 = arith.mulf %96, %100 : vector<16x16xf32>
    %cst_50 = arith.constant dense<0.000000e+00> : vector<16x8xf32>
    %102 = tpu.matmul %101, %89, %cst_50 {dimension_numbers = #tpu.dot_dimension_numbers<[1], [0], [0], [1], [0, 0, 1, 1], [], []>} : vector<16x16xf32>, vector<16x8xf32>, vector<16x8xf32> -> vector<16x8xf32>
    %c24 = arith.constant 24 : index
    %c0_51 = arith.constant 0 : index
    %103 = vector.load %arg10[%c24, %c0_51] : memref<32x32xf32, #tpu.memory_space<vmem>>, vector<8x32xf32>
    %cst_52 = arith.constant dense<0.000000e+00> : vector<16x32xf32>
    %104 = tpu.matmul %102, %103, %cst_52 {dimension_numbers = #tpu.dot_dimension_numbers<[1], [0], [0], [1], [0, 0, 1, 1], [], []>} : vector<16x8xf32>, vector<8x32xf32>, vector<16x32xf32> -> vector<16x32xf32>
    %105 = arith.addf %84, %104 : vector<16x32xf32>
    %c0_53 = arith.constant 0 : index
    %c0_54 = arith.constant 0 : index
    %106 = vector.load %arg11[%c0_53, %c0_54] : memref<1x32xf32, #tpu.memory_space<vmem>>, vector<1x32xf32>
    %107 = vector.broadcast %106 : vector<1x32xf32> to vector<16x32xf32>
    %108 = arith.addf %105, %107 : vector<16x32xf32>
    %109 = arith.addf %19, %108 : vector<16x32xf32>
    %cst_55 = arith.constant dense<0.000000e+00> : vector<16xf32>
    %110 = vector.multi_reduction <add>, %109, %cst_55 [1] : vector<16x32xf32> to vector<16xf32>
    %111 = vector.shape_cast %110 : vector<16xf32> to vector<16x1xf32>
    %cst_56 = arith.constant 3.200000e+01 : f32
    %112 = vector.broadcast %cst_56 : f32 to vector<16x1xf32>
    %113 = arith.divf %111, %112 : vector<16x1xf32>
    %114 = vector.broadcast %113 : vector<16x1xf32> to vector<16x32xf32>
    %115 = arith.subf %109, %114 : vector<16x32xf32>
    %116 = arith.mulf %115, %115 : vector<16x32xf32>
    %cst_57 = arith.constant dense<0.000000e+00> : vector<16xf32>
    %117 = vector.multi_reduction <add>, %116, %cst_57 [1] : vector<16x32xf32> to vector<16xf32>
    %118 = vector.shape_cast %117 : vector<16xf32> to vector<16x1xf32>
    %cst_58 = arith.constant 3.200000e+01 : f32
    %119 = vector.broadcast %cst_58 : f32 to vector<16x1xf32>
    %120 = arith.divf %118, %119 : vector<16x1xf32>
    %121 = vector.broadcast %113 : vector<16x1xf32> to vector<16x32xf32>
    %122 = arith.subf %109, %121 : vector<16x32xf32>
    %cst_59 = arith.constant 9.99999974E-6 : f32
    %123 = vector.broadcast %cst_59 : f32 to vector<16x1xf32>
    %124 = arith.addf %120, %123 : vector<16x1xf32>
    %125 = math.rsqrt %124 : vector<16x1xf32>
    %126 = vector.broadcast %125 : vector<16x1xf32> to vector<16x32xf32>
    %127 = arith.mulf %122, %126 : vector<16x32xf32>
    %c0_60 = arith.constant 0 : index
    %c0_61 = arith.constant 0 : index
    %128 = vector.load %arg12[%c0_60, %c0_61] : memref<1x32xf32, #tpu.memory_space<vmem>>, vector<1x32xf32>
    %129 = vector.broadcast %128 : vector<1x32xf32> to vector<16x32xf32>
    %130 = arith.mulf %127, %129 : vector<16x32xf32>
    %c0_62 = arith.constant 0 : index
    %c0_63 = arith.constant 0 : index
    %131 = vector.load %arg13[%c0_62, %c0_63] : memref<1x32xf32, #tpu.memory_space<vmem>>, vector<1x32xf32>
    %132 = vector.broadcast %131 : vector<1x32xf32> to vector<16x32xf32>
    %133 = arith.addf %130, %132 : vector<16x32xf32>
    %134 = arith.truncf %133 : vector<16x32xf32> to vector<16x32xbf16>
    %c0_64 = arith.constant 0 : index
    %c0_65 = arith.constant 0 : index
    %135 = vector.load %arg14[%c0_64, %c0_65] : memref<32x2048xbf16, #tpu.memory_space<vmem>>, vector<32x2048xbf16>
    %cst_66 = arith.constant dense<0.000000e+00> : vector<16x2048xf32>
    %136 = tpu.matmul %134, %135, %cst_66 {dimension_numbers = #tpu.dot_dimension_numbers<[1], [0], [0], [1], [0, 0, 1, 1], [], []>} : vector<16x32xbf16>, vector<32x2048xbf16>, vector<16x2048xf32> -> vector<16x2048xf32>
    %c0_67 = arith.constant 0 : index
    %c0_68 = arith.constant 0 : index
    %137 = vector.load %arg15[%c0_67, %c0_68] : memref<1x2048xf32, #tpu.memory_space<vmem>>, vector<1x2048xf32>
    %138 = vector.broadcast %137 : vector<1x2048xf32> to vector<16x2048xf32>
    %139 = arith.addf %136, %138 : vector<16x2048xf32>
    %cst_69 = arith.constant 0.000000e+00 : f32
    %140 = vector.broadcast %cst_69 : f32 to vector<16x2048xf32>
    %141 = arith.maximumf %139, %140 : vector<16x2048xf32>
    %142 = arith.truncf %141 : vector<16x2048xf32> to vector<16x2048xbf16>
    %c0_70 = arith.constant 0 : index
    %c0_71 = arith.constant 0 : index
    %143 = vector.load %arg16[%c0_70, %c0_71] : memref<2048x32xbf16, #tpu.memory_space<vmem>>, vector<2048x32xbf16>
    %cst_72 = arith.constant dense<0.000000e+00> : vector<16x32xf32>
    %144 = tpu.matmul %142, %143, %cst_72 {dimension_numbers = #tpu.dot_dimension_numbers<[1], [0], [0], [1], [0, 0, 1, 1], [], []>} : vector<16x2048xbf16>, vector<2048x32xbf16>, vector<16x32xf32> -> vector<16x32xf32>
    %c0_73 = arith.constant 0 : index
    %c0_74 = arith.constant 0 : index
    %145 = vector.load %arg17[%c0_73, %c0_74] : memref<1x32xf32, #tpu.memory_space<vmem>>, vector<1x32xf32>
    %146 = vector.broadcast %145 : vector<1x32xf32> to vector<16x32xf32>
    %147 = arith.addf %144, %146 : vector<16x32xf32>
    %148 = arith.addf %133, %147 : vector<16x32xf32>
    %cst_75 = arith.constant dense<0.000000e+00> : vector<16xf32>
    %149 = vector.multi_reduction <add>, %148, %cst_75 [1] : vector<16x32xf32> to vector<16xf32>
    %150 = vector.shape_cast %149 : vector<16xf32> to vector<16x1xf32>
    %cst_76 = arith.constant 3.200000e+01 : f32
    %151 = vector.broadcast %cst_76 : f32 to vector<16x1xf32>
    %152 = arith.divf %150, %151 : vector<16x1xf32>
    %153 = vector.broadcast %152 : vector<16x1xf32> to vector<16x32xf32>
    %154 = arith.subf %148, %153 : vector<16x32xf32>
    %155 = arith.mulf %154, %154 : vector<16x32xf32>
    %cst_77 = arith.constant dense<0.000000e+00> : vector<16xf32>
    %156 = vector.multi_reduction <add>, %155, %cst_77 [1] : vector<16x32xf32> to vector<16xf32>
    %157 = vector.shape_cast %156 : vector<16xf32> to vector<16x1xf32>
    %cst_78 = arith.constant 3.200000e+01 : f32
    %158 = vector.broadcast %cst_78 : f32 to vector<16x1xf32>
    %159 = arith.divf %157, %158 : vector<16x1xf32>
    %160 = vector.broadcast %152 : vector<16x1xf32> to vector<16x32xf32>
    %161 = arith.subf %148, %160 : vector<16x32xf32>
    %cst_79 = arith.constant 9.99999974E-6 : f32
    %162 = vector.broadcast %cst_79 : f32 to vector<16x1xf32>
    %163 = arith.addf %159, %162 : vector<16x1xf32>
    %164 = math.rsqrt %163 : vector<16x1xf32>
    %165 = vector.broadcast %164 : vector<16x1xf32> to vector<16x32xf32>
    %166 = arith.mulf %161, %165 : vector<16x32xf32>
    %c0_80 = arith.constant 0 : index
    %c0_81 = arith.constant 0 : index
    %167 = vector.load %arg18[%c0_80, %c0_81] : memref<1x32xf32, #tpu.memory_space<vmem>>, vector<1x32xf32>
    %168 = vector.broadcast %167 : vector<1x32xf32> to vector<16x32xf32>
    %169 = arith.mulf %166, %168 : vector<16x32xf32>
    %c0_82 = arith.constant 0 : index
    %c0_83 = arith.constant 0 : index
    %170 = vector.load %arg19[%c0_82, %c0_83] : memref<1x32xf32, #tpu.memory_space<vmem>>, vector<1x32xf32>
    %171 = vector.broadcast %170 : vector<1x32xf32> to vector<16x32xf32>
    %172 = arith.addf %169, %171 : vector<16x32xf32>
    %c0_84 = arith.constant 0 : index
    %c0_85 = arith.constant 0 : index
    %173 = vector.load %arg20[%c0_84, %c0_85] : memref<32x128xf32, #tpu.memory_space<vmem>>, vector<32x128xf32>
    %cst_86 = arith.constant dense<0.000000e+00> : vector<16x128xf32>
    %174 = tpu.matmul %172, %173, %cst_86 {dimension_numbers = #tpu.dot_dimension_numbers<[1], [0], [0], [1], [0, 0, 1, 1], [], []>} : vector<16x32xf32>, vector<32x128xf32>, vector<16x128xf32> -> vector<16x128xf32>
    %c0_87 = arith.constant 0 : index
    %c0_88 = arith.constant 0 : index
    %175 = vector.load %arg21[%c0_87, %c0_88] : memref<1x128xf32, #tpu.memory_space<vmem>>, vector<1x128xf32>
    %176 = vector.broadcast %175 : vector<1x128xf32> to vector<16x128xf32>
    %177 = arith.addf %174, %176 : vector<16x128xf32>
    %178 = tpu.iota {dimensions = array<i32: 1>} : vector<16x128xi32>
    %c2_i32 = arith.constant 2 : i32
    %179 = vector.broadcast %c2_i32 : i32 to vector<16x128xi32>
    %180 = arith.cmpi slt, %178, %179 : vector<16x128xi32>
    %c4_i32 = arith.constant 4 : i32
    %181 = vector.broadcast %c4_i32 : i32 to vector<16x128xi32>
    %182 = arith.cmpi slt, %178, %181 : vector<16x128xi32>
    %183 = math.exp %177 : vector<16x128xf32>
    %184 = math.tanh %177 : vector<16x128xf32>
    %185 = arith.select %182, %183, %184 : vector<16x128xi1>, vector<16x128xf32>
    %186 = arith.select %180, %177, %185 : vector<16x128xi1>, vector<16x128xf32>
    %c0_89 = arith.constant 0 : index
    %c0_90 = arith.constant 0 : index
    %c0_91 = arith.constant 0 : index
    %187 = vector.load %arg22[%c0_89, %c0_90, %c0_91] : memref<1x16x128xf32, #tpu.memory_space<vmem>>, vector<1x16x128xf32>
    %188 = vector.shape_cast %187 : vector<1x16x128xf32> to vector<16x128xf32>
    %189 = vector.shape_cast %186 : vector<16x128xf32> to vector<1x16x128xf32>
    tpu.vector_store %arg22[%c0_89, %c0_90, %c0_91], %189 {strides = array<i32>} : memref<1x16x128xf32, #tpu.memory_space<vmem>>, vector<1x16x128xf32>,
    return
  }
  func.func @transform_0(%arg0: i32) -> (i32, i32, i32) {
    %c0_i32 = arith.constant 0 : i32
    %c0_i32_0 = arith.constant 0 : i32
    %c0_i32_1 = arith.constant 0 : i32
    return %arg0, %c0_i32, %c0_i32_0 : i32, i32, i32
  }
  func.func @transform_1(%arg0: i32) -> (i32, i32, i32) {
    %c0_i32 = arith.constant 0 : i32
    %c0_i32_0 = arith.constant 0 : i32
    %c0_i32_1 = arith.constant 0 : i32
    return %arg0, %c0_i32, %c0_i32_0 : i32, i32, i32
  }
  func.func @transform_2(%arg0: i32) -> (i32, i32, i32) {
    %c0_i32 = arith.constant 0 : i32
    %c0_i32_0 = arith.constant 0 : i32
    %c0_i32_1 = arith.constant 0 : i32
    return %arg0, %c0_i32, %c0_i32_0 : i32, i32, i32
  }
  func.func @transform_3(%arg0: i32) -> (i32, i32) {
    %c0_i32 = arith.constant 0 : i32
    %c0_i32_0 = arith.constant 0 : i32
    %c0_i32_1 = arith.constant 0 : i32
    return %c0_i32, %c0_i32_0 : i32, i32
  }
  func.func @transform_4(%arg0: i32) -> (i32, i32) {
    %c0_i32 = arith.constant 0 : i32
    %c0_i32_0 = arith.constant 0 : i32
    %c0_i32_1 = arith.constant 0 : i32
    return %c0_i32, %c0_i32_0 : i32, i32
  }
  func.func @transform_5(%arg0: i32) -> (i32, i32) {
    %c0_i32 = arith.constant 0 : i32
    %c0_i32_0 = arith.constant 0 : i32
    %c0_i32_1 = arith.constant 0 : i32
    return %c0_i32, %c0_i32_0 : i32, i32
  }
  func.func @transform_6(%arg0: i32) -> (i32, i32) {
    %c0_i32 = arith.constant 0 : i32
    %c0_i32_0 = arith.constant 0 : i32
    %c0_i32_1 = arith.constant 0 : i32
    return %c0_i32, %c0_i32_0 : i32, i32
  }
  func.func @transform_7(%arg0: i32) -> (i32, i32) {
    %c0_i32 = arith.constant 0 : i32
    %c0_i32_0 = arith.constant 0 : i32
    %c0_i32_1 = arith.constant 0 : i32
    return %c0_i32, %c0_i32_0 : i32, i32
  }
  func.func @transform_8(%arg0: i32) -> (i32, i32) {
    %c0_i32 = arith.constant 0 : i32
    %c0_i32_0 = arith.constant 0 : i32
    %c0_i32_1 = arith.constant 0 : i32
    return %c0_i32, %c0_i32_0 : i32, i32
  }
  func.func @transform_9(%arg0: i32) -> (i32, i32) {
    %c0_i32 = arith.constant 0 : i32
    %c0_i32_0 = arith.constant 0 : i32
    %c0_i32_1 = arith.constant 0 : i32
    return %c0_i32, %c0_i32_0 : i32, i32
  }
  func.func @transform_10(%arg0: i32) -> (i32, i32) {
    %c0_i32 = arith.constant 0 : i32
    %c0_i32_0 = arith.constant 0 : i32
    %c0_i32_1 = arith.constant 0 : i32
    return %c0_i32, %c0_i32_0 : i32, i32
  }
  func.func @transform_11(%arg0: i32) -> (i32, i32) {
    %c0_i32 = arith.constant 0 : i32
    %c0_i32_0 = arith.constant 0 : i32
    %c0_i32_1 = arith.constant 0 : i32
    return %c0_i32, %c0_i32_0 : i32, i32
  }
  func.func @transform_12(%arg0: i32) -> (i32, i32) {
    %c0_i32 = arith.constant 0 : i32
    %c0_i32_0 = arith.constant 0 : i32
    %c0_i32_1 = arith.constant 0 : i32
    return %c0_i32, %c0_i32_0 : i32, i32
  }
  func.func @transform_13(%arg0: i32) -> (i32, i32) {
    %c0_i32 = arith.constant 0 : i32
    %c0_i32_0 = arith.constant 0 : i32
    %c0_i32_1 = arith.constant 0 : i32
    return %c0_i32, %c0_i32_0 : i32, i32
  }
  func.func @transform_14(%arg0: i32) -> (i32, i32) {
    %c0_i32 = arith.constant 0 : i32
    %c0_i32_0 = arith.constant 0 : i32
    %c0_i32_1 = arith.constant 0 : i32
    return %c0_i32, %c0_i32_0 : i32, i32
  }
  func.func @transform_15(%arg0: i32) -> (i32, i32) {
    %c0_i32 = arith.constant 0 : i32
    %c0_i32_0 = arith.constant 0 : i32
    %c0_i32_1 = arith.constant 0 : i32
    return %c0_i32, %c0_i32_0 : i32, i32
  }
  func.func @transform_16(%arg0: i32) -> (i32, i32) {
    %c0_i32 = arith.constant 0 : i32
    %c0_i32_0 = arith.constant 0 : i32
    %c0_i32_1 = arith.constant 0 : i32
    return %c0_i32, %c0_i32_0 : i32, i32
  }
  func.func @transform_17(%arg0: i32) -> (i32, i32) {
    %c0_i32 = arith.constant 0 : i32
    %c0_i32_0 = arith.constant 0 : i32
    %c0_i32_1 = arith.constant 0 : i32
    return %c0_i32, %c0_i32_0 : i32, i32
  }
  func.func @transform_18(%arg0: i32) -> (i32, i32) {
    %c0_i32 = arith.constant 0 : i32
    %c0_i32_0 = arith.constant 0 : i32
    %c0_i32_1 = arith.constant 0 : i32
    return %c0_i32, %c0_i32_0 : i32, i32
  }
  func.func @transform_19(%arg0: i32) -> (i32, i32) {
    %c0_i32 = arith.constant 0 : i32
    %c0_i32_0 = arith.constant 0 : i32
    %c0_i32_1 = arith.constant 0 : i32
    return %c0_i32, %c0_i32_0 : i32, i32
  }
  func.func @transform_20(%arg0: i32) -> (i32, i32) {
    %c0_i32 = arith.constant 0 : i32
    %c0_i32_0 = arith.constant 0 : i32
    %c0_i32_1 = arith.constant 0 : i32
    return %c0_i32, %c0_i32_0 : i32, i32
  }
  func.func @transform_21(%arg0: i32) -> (i32, i32, i32) {
    %c0_i32 = arith.constant 0 : i32
    %c0_i32_0 = arith.constant 0 : i32
    %c0_i32_1 = arith.constant 0 : i32
    return %arg0, %c0_i32, %c0_i32_0 : i32, i32, i32
  }
}

</mosaic_0001>

<bundles_post_ra>
// kernel: decoder_forward.1
= control target key start
LH: loop header
LB: loop body
LE: loop exit
PB: predicated region body
PF: predicated region fallthrough
CT: control target
= control target key end

     0   :  { %vm77_vm0 = vcmask 1041408   ;;  %vm105_vm1 = vcmask 1042432   ;;  %vm73_vm2 = vcmask 15360   ;;  %vm101_vm3 = vcmask 23552   ;;  %s3616_s25 = smov 96   ;;  %s3619_s27 = smov 56   ;;  %s4627_s7 = inlined_call_operand.vmem [shape: f32[2,128], index: 7, kind: input, shape index: {}]   ;;  %s4628_s6 = inlined_call_operand.vmem [shape: f32[3,128], index: 6, kind: input, shape index: {}]   ;;  %s4629_s2 = inlined_call_operand.vmem [shape: f32[1,2,2], index: 2, kind: input, shape index: {}]   ;;  %s4630_s1 = inlined_call_operand.vmem [shape: f32[1,2,3], index: 1, kind: input, shape index: {}]   ;;  %s4631_s5 = inlined_call_operand.vmem [shape: f32[32,128], index: 5, kind: input, shape index: {}]   ;;  %s4632_s8 = inlined_call_operand.vmem [shape: f32[1,128], index: 8, kind: input, shape index: {}]   ;;  %s4633_s0 = inlined_call_operand.vmem [shape: f32[1,16,32], index: 0, kind: input, shape index: {}]   ;;  %s4634_s3 = inlined_call_operand.vmem [shape: f32[16,2], index: 3, kind: input, shape index: {}]   ;;  %s4635_s4 = inlined_call_operand.vmem [shape: f32[16,16], index: 4, kind: input, shape index: {}]   ;;  %s4636_s9 = inlined_call_operand.vmem [shape: f32[32,32], index: 9, kind: input, shape index: {}]   ;;  %s4637_s10 = inlined_call_operand.vmem [shape: f32[1,32], index: 10, kind: input, shape index: {}]   ;;  %s4638_s11 = inlined_call_operand.vmem [shape: f32[1,32], index: 11, kind: input, shape index: {}]   ;;  %s4639_s12 = inlined_call_operand.vmem [shape: f32[1,32], index: 12, kind: input, shape index: {}]   ;;  %s4640_s13 = inlined_call_operand.vmem [shape: bf16[32,2048], index: 13, kind: input, shape index: {}]   ;;  %s4641_s15 = inlined_call_operand.vmem [shape: bf16[2048,32], index: 15, kind: input, shape index: {}]   ;;  %s4642_s16 = inlined_call_operand.vmem [shape: f32[1,32], index: 16, kind: input, shape index: {}]   ;;  %s4643_s14 = inlined_call_operand.vmem [shape: f32[1,2048], index: 14, kind: input, shape index: {}]   ;;  %s4644_s17 = inlined_call_operand.vmem [shape: f32[1,32], index: 17, kind: input, shape index: {}]   ;;  %s4645_s18 = inlined_call_operand.vmem [shape: f32[1,32], index: 18, kind: input, shape index: {}]   ;;  %s4646_s20 = inlined_call_operand.vmem [shape: f32[1,128], index: 20, kind: input, shape index: {}]   ;;  %s4647_s19 = inlined_call_operand.vmem [shape: f32[32,128], index: 19, kind: input, shape index: {}]   ;;  %s4648_s21 = inlined_call_operand.vmem [shape: f32[1,16,128], index: 21, kind: output, shape index: {}]  }
   0x1   :  { %4650 = sst [smem:[#allocation2_spill]] %s4627_s7  ;;  %v134_v8 = vld [vmem:[%s4633_s0] sm:$0xff]  ;;  %vm174_vm4 = vcmask 261120   ;;  %v135_v9 = vld [vmem:[%s4633_s0 + $0x8] sm:$0xff]  ;;  %vm220_vm5 = vcmask 64512   ;;  %vm252_vm6 = vcmask 130048  }
   0x2   :  { %4651 = sst [smem:[#allocation3_spill]] %s4628_s6  ;;  %v140_v15 = vld [vmem:[%s4634_s3] sm:$0xff]  ;;  %v141_v16 = vld [vmem:[%s4634_s3 + $0x8] sm:$0xff]  ;;  %s3618_s3 = smov 32  }
   0x3   :  { %4652 = sst [smem:[#allocation4_spill]] %s4629_s2  ;;  %v3822_v34 = vld [vmem:[%s4635_s4] sm:$0xff]  ;;  %v3829_v38 = vld [vmem:[%s4635_s4 + $0x8] sm:$0xff]  ;;  %s3623_s4 = smov 80  }
   0x4   :  { %4653 = sst [smem:[#allocation5_spill]] %s4630_s1  ;;  %s3620_s1 = smov 88   ;;  %v310_v53 = vld [vmem:[%s4636_s9] sm:$0xff] }
   0x5   :  { %4654 = sst [smem:[#allocation6_spill]] %s4631_s5  ;;  %s3622_s5 = smov 72  }
   0x6   :  { %4655 = sst [smem:[#allocation7_spill]] %s4632_s8  ;;  %s3626_s2 = smov 16  }
   0x7   :  { %s4656_s26 = sld [smem:[#allocation2_spill]]  ;;  %s3627_s0 = smov 8  }
   0x8   :  { %s4657_s28 = sld [smem:[#allocation3_spill]] }
   0x9   :  { %s4658_s7 = sld [smem:[#allocation4_spill]] }
   0xa   :  { %s4659_s22 = sld [smem:[#allocation5_spill]] }
   0xb   :  { %s4660_s24 = sld [smem:[#allocation6_spill]] }
   0xc   :  { %s4661_s23 = sld [smem:[#allocation7_spill]] }
   0xd   :  { %v72_v0 = vld [vmem:[%s4656_s26] sm:$0x3]  ;;  %s3617_s26 = smov 64  }
   0xe   :  { %v70_v1 = vld [vmem:[%s4657_s28] sm:$0x7]  ;;  %2664 = vmatpush.msk.msra.mxu0 %vm77_vm0, %v72_v0  ;;  %s3621_s28 = smov 48  }
   0xf   :  { %v71_v2 = vld [vmem:[%s4658_s7] sm:$0x3]  ;;  %2666 = vmatpush.msk.msra.mxu1 %vm105_vm1, %v70_v1 }
  0x10   :  { %v69_v3 = vld [vmem:[%s4659_s22] sm:$0x3]  ;;  %2665 = vmatmul.msk.f32.vlgmr.msra.gmra.mxu0 %vm73_vm2, %v71_v2  ;;  %s3624_s22 = smov 40  }
  0x11   :  { %v139_v4 = vld [vmem:[%s4660_s24 + $0x18] sm:$0xff]  ;;  %2667 = vmatmul.msk.f32.vlgmr.msra.gmra.mxu1 %vm101_vm3, %v69_v3  ;;  %v138_v5 = vld [vmem:[%s4660_s24 + $0x10] sm:$0xff]  ;;  %v137_v6 = vld [vmem:[%s4660_s24 + $0x8] sm:$0xff] }
  0x12   :  { %193 = vmatpush.msra.mxu3 %v139_v4  ;;  %v136_v7 = vld [vmem:[%s4660_s24] sm:$0xff]  ;;  %s3625_s24 = smov 24  }
  0x13   :  { %v3558_v10 = vld [vmem:[%s4661_s23] ss:$0 sm:$0xff] }
  0x14   :  { %194 = vmatpush.msra.mxu3 %v138_v5 }
  0x16   :  { %195 = vmatpush.msra.mxu3 %v137_v6 }
  0x18   :  { %196 = vmatpush.msra.mxu3 %v136_v7 }
  0x19   :  { %2671 = vmatmul.msk.f32.vlgmr.msra.gmra.mxu3 %vm174_vm4, %v134_v8 }
  0x21   :  { %2672 = vmatmul.msk.f32.gmra.mxu3 %vm174_vm4, %v135_v9 }
  0x8d   :  { %v98_v11 = vpop.f32.mrf.mxu0 }
  0x8e   :  { %v126_v12 = vpop.f32.mrf.mxu1 }
  0x8f   :  { %v127_v13 = vadd.f32 %v126_v12, %v98_v11 }
  0x91   :  { %v133_v14 = vadd.f32 %v3558_v10, %v127_v13 }
  0x93   :  { %2668 = vmatpush.msk.msra.mxu2 %vm77_vm0, %v133_v14 }
  0x94   :  { %2669 = vmatmul.msk.f32.vlgmr.msra.gmra.mxu2 %vm73_vm2, %v140_v15 }
  0x9c   :  { %2670 = vmatmul.msk.f32.gmra.mxu2 %vm73_vm2, %v141_v16  ;;  %v198_v17 = vpop.f32.mrf.mxu3 }
  0xa4   :  { %v201_v21 = vpop.f32.mrf.mxu3 }
 0x117   :  { %v168_v18 = vpop.f32.mrf.mxu2 }
 0x118   :  { %v3785_v19 = vadd.f32 %v198_v17, %v168_v18 }
 0x11a   :  { %v3788_v20 = vmul.f32 0.35355338, %v3785_v19 }
 0x11c   :  { %210 = vrot.lane.b32.xlu1 %v3788_v20, %s3616_s25 }
 0x11f   :  { %v171_v22 = vpop.f32.mrf.mxu2 }
 0x120   :  { %v3791_v23 = vadd.f32 %v201_v21, %v171_v22 }
 0x122   :  { %218 = vrot.lane.b32.xlu0 %v3791_v23, %s3617_s26  ;;  %v3795_v24 = vmul.f32 0.35355338, %v3791_v23  ;;  %v3801_v25 = vpack.i.bf16 %v3785_v19, %v3791_v23 }
 0x124   :  { %212 = vrot.lane.b32.xlu1 %v3795_v24, %s3616_s25 }
 0x12a   :  { %216 = vrot.lane.b32.xlu0 %v3785_v19, %s3617_s26 }
 0x12c   :  { %3539 = vrot.lane.b32.xlu1 %v3801_v25, %s3618_s3 }
 0x134   :  { %317 = vrot.lane.b32.xlu1 %v3791_v23, %s3619_s27 }
 0x13c   :  { %311 = vrot.lane.b32.xlu1 %v3788_v20, %s3620_s1 }
 0x144   :  { %313 = vrot.lane.b32.xlu1 %v3795_v24, %s3620_s1 }
 0x14c   :  { %472 = vrot.lane.b32.xlu1 %v3791_v23, %s3621_s28 }
 0x154   :  { %470 = vrot.lane.b32.xlu1 %v3785_v19, %s3621_s28 }
 0x15c   :  { %594 = vrot.lane.b32.xlu1 %v3788_v20, %s3622_s5 }
 0x164   :  { %596 = vrot.lane.b32.xlu1 %v3795_v24, %s3622_s5 }
 0x18e   :  { %v211_v26 = vpop.permute.xlu1 %210 }
 0x194   :  { %v219_v27 = vpop.permute.xlu0 %218 }
 0x195   :  { %2673 = vmatpush.xpose.msk.msrb.mxu0 %vm220_vm5, %v219_v27  ;;  %3523 = vmatpush.xpose.msk.msrb.mxu1 %vm220_vm5, %v219_v27 }
 0x196   :  { %v213_v28 = vpop.permute.xlu1 %212 }
 0x19c   :  { %v217_v29 = vpop.permute.xlu0 %216 }
 0x19d   :  { %2674 = vmatpush.xpose.msk.msrb.mxu0 %vm220_vm5, %v217_v29  ;;  %3524 = vmatpush.xpose.msk.msrb.mxu1 %vm220_vm5, %v217_v29 }
 0x19e   :  { %v3540_v30 = vpop.permute.xlu1 %3539 }
 0x19f   :  { %v3541_v31 = vunpack.i.l.bf16 %v3540_v30  ;;  %v3542_v32 = vunpack.i.h.bf16 %v3540_v30 }
 0x1a0   :  { %2675 = vmatmul.msk.f32.vlgmr.msrb.gmra.mxu0 %vm220_vm5, %v211_v26  ;;  %2676 = vmatmul.msk.f32.vlgmr.msrb.gmra.mxu1 %vm220_vm5, %v213_v28 }
 0x1a1   :  { %301 = vmatpush.msra.mxu1 %v3541_v31 }
 0x1a3   :  { %302 = vmatpush.msra.mxu1 %v3542_v32 }
 0x1a5   :  { %458 = vmatpush.msrb.mxu1 %v310_v53 }
 0x1a6   :  { %v318_v33 = vpop.permute.xlu1 %317 }
 0x1a7   :  { %2679 = vmatpush.xpose.msk.msrb.mxu2 %vm220_vm5, %v318_v33 }
 0x1ae   :  { %v312_v52 = vpop.permute.xlu1 %311 }
 0x1b6   :  { %v314_v55 = vpop.permute.xlu1 %313 }
 0x1be   :  { %v473_v59 = vpop.permute.xlu1 %472 }
 0x1c6   :  { %v471_v63 = vpop.permute.xlu1 %470 }
 0x1ce   :  { %v595_v6 = vpop.permute.xlu1 %594 }
 0x1d6   :  { %v597_v10 = vpop.permute.xlu1 %596 }
 0x21d   :  { %v246_v35 = vpop.f32.mrf.mxu0  ;;  %v249_v39 = vpop.f32.mrf.mxu1 }
 0x21e   :  { %v247_v36 = vadd.f32 %v246_v35, %v3822_v34  ;;  %v250_v40 = vadd.f32 %v249_v39, %v3829_v38 }
 0x220   :  { %v253_v37 = vsel %vm252_vm6, %v247_v36, -inf  ;;  %v256_v41 = vsel %vm252_vm6, %v250_v40, -inf }
 0x221   :  { %254 = vmax.xlane.f32.xlu2 %v253_v37 }
 0x229   :  { %257 = vmax.xlane.f32.xlu2 %v256_v41 }
 0x294   :  { %v255_v42 = vpop.xlane.xlu2 %254 }
 0x295   :  { %v259_v43 = vsub.f32 %v247_v36, %v255_v42 }
 0x297   :  { %v261_v44 = vmul.f32 1.442695, %v259_v43 }
 0x299   :  { %3566 = vpow2.f32 %v261_v44 }
 0x29c   :  { %v258_v45 = vpop.xlane.xlu2 %257 }
 0x29d   :  { %v260_v46 = vsub.f32 %v250_v40, %v258_v45 }
 0x29f   :  { %v3567_v47 = vpop.eup %3566  ;;  %v263_v48 = vmul.f32 1.442695, %v260_v46 }
 0x2a0   :  { %v265_v49 = vsel %vm252_vm6, %v3567_v47, 0.0 }
 0x2a1   :  { %3568 = vpow2.f32 %v263_v48  ;;  %266 = vadd.xlane.f32.xlu0 %v265_v49 }
 0x2a7   :  { %v3569_v50 = vpop.eup %3568 }
 0x2a8   :  { %v268_v51 = vsel %vm252_vm6, %v3569_v50, 0.0 }
 0x2a9   :  { %269 = vadd.xlane.f32.xlu2 %v268_v51 }
 0x2b5   :  { %466 = vrot.lane.b32.xlu0 %v3788_v20, %s3623_s4 }
 0x2c1   :  { %315 = vrot.lane.b32.xlu2 %v3785_v19, %s3619_s27 }
 0x2c9   :  { %600 = vrot.lane.b32.xlu2 %v3791_v23, %s3624_s22 }
 0x2d1   :  { %598 = vrot.lane.b32.xlu2 %v3785_v19, %s3624_s22 }
 0x2d9   :  { %468 = vrot.lane.b32.xlu2 %v3795_v24, %s3623_s4 }
 0x314   :  { %v267_v54 = vpop.xlane.xlu0 %266 }
 0x315   :  { %3570 = vrcp.f32 %v267_v54 }
 0x31b   :  { %v3571_v56 = vpop.eup %3570 }
 0x31c   :  { %v273_v57 = vmul.f32 %v3571_v56, %v3567_v47  ;;  %v270_v58 = vpop.xlane.xlu2 %269 }
 0x31d   :  { %3572 = vrcp.f32 %v270_v58 }
 0x31e   :  { %2677 = vmatmul.msk.f32.vlgmr.msra.gmra.mxu1 %vm252_vm6, %v273_v57 }
 0x323   :  { %v3573_v60 = vpop.eup %3572 }
 0x324   :  { %v316_v61 = vpop.permute.xlu2 %315  ;;  %v274_v62 = vmul.f32 %v3573_v60, %v3569_v50 }
 0x325   :  { %2680 = vmatpush.xpose.msk.msrb.mxu2 %vm220_vm5, %v316_v61 }
 0x326   :  { %2678 = vmatmul.msk.f32.gmra.mxu1 %vm252_vm6, %v274_v62 }
 0x327   :  { %v467_v2 = vpop.permute.xlu0 %466 }
 0x328   :  { %2681 = vmatmul.msk.f32.vlgmr.msrb.gmra.mxu2 %vm220_vm5, %v312_v52 }
 0x329   :  { %2689 = vmatpush.xpose.msk.msra.mxu2 %vm220_vm5, %v473_v59 }
 0x32c   :  { %v601_v0 = vpop.permute.xlu2 %600 }
 0x32d   :  { %2690 = vmatpush.xpose.msk.msra.mxu2 %vm220_vm5, %v471_v63  ;;  %2697 = vmatpush.xpose.msk.msra.mxu1 %vm220_vm5, %v601_v0 }
 0x330   :  { %2682 = vmatmul.msk.f32.gmra.mxu2 %vm220_vm5, %v314_v55 }
 0x334   :  { %v599_v1 = vpop.permute.xlu2 %598 }
 0x335   :  { %2698 = vmatpush.xpose.msk.msra.mxu1 %vm220_vm5, %v599_v1 }
 0x338   :  { %2691 = vmatmul.msk.f32.vlgmr.msra.gmra.mxu2 %vm220_vm5, %v467_v2 }
 0x33c   :  { %v469_v3 = vpop.permute.xlu2 %468 }
 0x340   :  { %2692 = vmatmul.msk.f32.gmra.mxu2 %vm220_vm5, %v469_v3 }
 0x39b   :  { %v304_v4 = vpop.f32.mrf.mxu1 }
 0x39c   :  { %2687 = vmatmul.msk.f32.vlgmr.msrb.gmra.mxu1 %vm220_vm5, %v304_v4 }
 0x3a3   :  { %v307_v5 = vpop.f32.mrf.mxu1 }
 0x3a4   :  { %2688 = vmatmul.msk.f32.gmra.mxu1 %vm220_vm5, %v307_v5 }
 0x3ab   :  { %v344_v7 = vpop.f32.mrf.mxu2 }
 0x3ac   :  { %v345_v8 = vadd.f32 %v344_v7, %v3822_v34  ;;  %2699 = vmatmul.msk.f32.vlgmr.msra.gmra.mxu1 %vm220_vm5, %v595_v6 }
 0x3ae   :  { %v350_v9 = vsel %vm252_vm6, %v345_v8, -inf }
 0x3af   :  { %351 = vmax.xlane.f32.xlu2 %v350_v9 }
 0x3b3   :  { %v347_v11 = vpop.f32.mrf.mxu2 }
 0x3b4   :  { %v348_v12 = vadd.f32 %v347_v11, %v3829_v38  ;;  %2700 = vmatmul.msk.f32.gmra.mxu1 %vm220_vm5, %v597_v10 }
 0x3b6   :  { %v353_v13 = vsel %vm252_vm6, %v348_v12, -inf }
 0x3b7   :  { %354 = vmax.xlane.f32.xlu0 %v353_v13 }
 0x3bb   :  { %v499_v14 = vpop.f32.mrf.mxu2 }
 0x3bc   :  { %v500_v15 = vadd.f32 %v499_v14, %v3822_v34 }
 0x3be   :  { %v505_v16 = vsel %vm252_vm6, %v500_v15, -inf }
 0x3bf   :  { %506 = vmax.xlane.f32.xlu2 %v505_v16 }
 0x3c3   :  { %v502_v17 = vpop.f32.mrf.mxu2 }
 0x3c4   :  { %v503_v18 = vadd.f32 %v502_v17, %v3829_v38 }
 0x3c6   :  { %v508_v20 = vsel %vm252_vm6, %v503_v18, -inf }
 0x3c7   :  { %509 = vmax.xlane.f32.xlu2 %v508_v20 }
 0x419   :  { %v3867_v21 = vpop.f32.mrf.mxu1 }
 0x421   :  { %v3869_v22 = vpop.f32.mrf.mxu1 }
 0x422   :  { %v352_v24 = vpop.xlane.xlu2 %351 }
 0x423   :  { %v356_v26 = vsub.f32 %v345_v8, %v352_v24 }
 0x425   :  { %v358_v27 = vmul.f32 1.442695, %v356_v26 }
 0x427   :  { %3574 = vpow2.f32 %v358_v27 }
 0x429   :  { %v627_v28 = vpop.f32.mrf.mxu1 }
 0x42a   :  { %v628_v29 = vadd.f32 %v627_v28, %v3822_v34  ;;  %v355_v30 = vpop.xlane.xlu0 %354 }
 0x42b   :  { %v357_v31 = vsub.f32 %v348_v12, %v355_v30  ;;  %v407_v12 = vld [vmem:[%s4636_s9 + $0x8] sm:$0xff] }
 0x42c   :  { %v633_v32 = vsel %vm252_vm6, %v628_v29, -inf  ;;  %429 = vmatpush.msra.mxu0 %v407_v12 }
 0x42d   :  { %v360_v33 = vmul.f32 1.442695, %v357_v31  ;;  %634 = vmax.xlane.f32.xlu1 %v633_v32  ;;  %v3575_v35 = vpop.eup %3574 }
 0x42e   :  { %v362_v42 = vsel %vm252_vm6, %v3575_v35, 0.0 }
 0x42f   :  { %3576 = vpow2.f32 %v360_v33  ;;  %v690_v33 = vld [vmem:[%s4636_s9 + $0x18] sm:$0xff] }
 0x431   :  { %v630_v36 = vpop.f32.mrf.mxu1 }
 0x432   :  { %v631_v37 = vadd.f32 %v630_v36, %v3829_v38  ;;  %v507_v39 = vpop.xlane.xlu2 %506 }
 0x433   :  { %v511_v40 = vsub.f32 %v500_v15, %v507_v39 }
 0x434   :  { %v636_v41 = vsel %vm252_vm6, %v631_v37, -inf }
 0x435   :  { %v3577_v43 = vpop.eup %3576  ;;  %v513_v34 = vmul.f32 1.442695, %v511_v40  ;;  %637 = vmax.xlane.f32.xlu0 %v636_v41  ;;  %363 = vadd.xlane.f32.xlu1 %v362_v42 }
 0x436   :  { %v365_v44 = vsel %vm252_vm6, %v3577_v43, 0.0 }
 0x437   :  { %3578 = vpow2.f32 %v513_v34  ;;  %366 = vadd.xlane.f32.xlu2 %v365_v44  ;;  %v3559_v34 = vld [vmem:[%s4637_s10] ss:$0 sm:$0xff] }
 0x43a   :  { %v510_v49 = vpop.xlane.xlu2 %509 }
 0x43b   :  { %v512_v53 = vsub.f32 %v503_v18, %v510_v49 }
 0x43d   :  { %v3579_v45 = vpop.eup %3578  ;;  %v515_v56 = vmul.f32 1.442695, %v512_v53 }
 0x43e   :  { %v517_v46 = vsel %vm252_vm6, %v3579_v45, 0.0 }
 0x43f   :  { %518 = vadd.xlane.f32.xlu2 %v517_v46 }
 0x449   :  { %3544 = vrot.lane.b32.xlu0 %v3801_v25, %s3625_s24 }
 0x451   :  { %3554 = vrot.lane.b32.xlu0 %v3801_v25, %s3626_s2 }
 0x4a0   :  { %v635_v38 = vpop.xlane.xlu1 %634 }
 0x4a1   :  { %v639_v47 = vsub.f32 %v628_v29, %v635_v38 }
 0x4a3   :  { %v641_v48 = vmul.f32 1.442695, %v639_v47 }
 0x4a5   :  { %3580 = vpow2.f32 %v641_v48 }
 0x4a8   :  { %v638_v50 = vpop.xlane.xlu0 %637  ;;  %v364_v58 = vpop.xlane.xlu1 %363 }
 0x4a9   :  { %v640_v51 = vsub.f32 %v631_v37, %v638_v50 }
 0x4aa   :  { %v367_v61 = vpop.xlane.xlu2 %366 }
 0x4ab   :  { %v3581_v52 = vpop.eup %3580  ;;  %v643_v54 = vmul.f32 1.442695, %v640_v51 }
 0x4ac   :  { %v645_v55 = vsel %vm252_vm6, %v3581_v52, 0.0 }
 0x4ad   :  { %3582 = vpow2.f32 %v643_v54  ;;  %646 = vadd.xlane.f32.xlu1 %v645_v55  ;;  %v3628_v55 = vmov 32.0  }
 0x4ae   :  { %3584 = vpow2.f32 %v515_v56 }
 0x4af   :  { %3586 = vrcp.f32 %v364_v58 }
 0x4b0   :  { %3588 = vrcp.f32 %v367_v61 }
 0x4b2   :  { %v519_v4 = vpop.xlane.xlu2 %518 }
 0x4b3   :  { %v3583_v57 = vpop.eup %3582  ;;  %3590 = vrcp.f32 %v519_v4 }
 0x4b4   :  { %v648_v59 = vsel %vm252_vm6, %v3583_v57, 0.0  ;;  %v3585_v60 = vpop.eup %3584 }
 0x4b5   :  { %649 = vadd.xlane.f32.xlu2 %v648_v59  ;;  %v3587_v63 = vpop.eup %3586  ;;  %v520_v0 = vsel %vm252_vm6, %v3585_v60, 0.0 }
 0x4b6   :  { %v370_v3 = vmul.f32 %v3587_v63, %v3575_v35  ;;  %v3589_v6 = vpop.eup %3588 }
 0x4b7   :  { %v371_v9 = vmul.f32 %v3589_v6, %v3577_v43  ;;  %v3387_v6 = vld [vmem:[%s4640_s13 + $0xbc] sm:$0xf0] }
 0x4b9   :  { %v3591_v10 = vpop.eup %3590 }
 0x4ba   :  { %v525_v11 = vmul.f32 %v3591_v10, %v3579_v45  ;;  %v2779_v10 = vld [vmem:[%s4640_s13 + $0x88] sm:$0xf] }
 0x4bb   :  { %v3545_v62 = vpop.permute.xlu0 %3544 }
 0x4bc   :  { %v3546_v1 = vunpack.i.l.bf16 %v3545_v62  ;;  %v3547_v2 = vunpack.i.h.bf16 %v3545_v62 }
 0x4bd   :  { %521 = vadd.xlane.f32.xlu2 %v520_v0 }
 0x4be   :  { %398 = vmatpush.msrb.mxu3 %v3546_v1 }
 0x4c0   :  { %399 = vmatpush.msrb.mxu3 %v3547_v2 }
 0x4c1   :  { %2683 = vmatmul.msk.f32.vlgmr.msrb.gmra.mxu3 %vm252_vm6, %v370_v3 }
 0x4c3   :  { %v3555_v5 = vpop.permute.xlu0 %3554 }
 0x4c4   :  { %v3556_v7 = vunpack.i.l.bf16 %v3555_v5  ;;  %v3557_v8 = vunpack.i.h.bf16 %v3555_v5  ;;  %v2771_v5 = vld [vmem:[%s4640_s13 + $0x80] sm:$0xf] }
 0x4c6   :  { %553 = vmatpush.msra.mxu3 %v3556_v7  ;;  %3549 = vrot.lane.b32.xlu1 %v3801_v25, %s3627_s0  ;;  %v562_v25 = vld [vmem:[%s4636_s9 + $0x10] sm:$0xff]  ;;  %v3379_v7 = vld [vmem:[%s4640_s13 + $0x84] sm:$0xf] }
 0x4c7   :  { %584 = vmatpush.msrb.mxu0 %v562_v25  ;;  %v2781_v25 = vld [vmem:[%s4640_s13 + $0xc8] sm:$0xf0] }
 0x4c8   :  { %554 = vmatpush.msra.mxu3 %v3557_v8  ;;  %v2772_v8 = vor.u32 %v3387_v6, %v2771_v5 }
 0x4c9   :  { %2684 = vmatmul.msk.f32.gmra.mxu3 %vm252_vm6, %v371_v9  ;;  %v2773_v9 = vld [vmem:[%s4640_s13 + $0xc0] sm:$0xf0] }
 0x4ca   :  { %712 = vmatpush.msrb.mxu3 %v690_v33  ;;  %v2717_v33 = vld [vmem:[%s4640_s13 + $0x48] sm:$0xf0] }
 0x4d1   :  { %2693 = vmatmul.msk.f32.vlgmr.msra.gmra.mxu3 %vm252_vm6, %v525_v11  ;;  %v3388_v11 = vld [vmem:[%s4640_s13 + $0xc4] sm:$0xf0] }
 0x520   :  { %v647_v14 = vpop.xlane.xlu1 %646 }
 0x528   :  { %v650_v13 = vpop.xlane.xlu2 %649 }
 0x530   :  { %v522_v15 = vpop.xlane.xlu2 %521 }
 0x531   :  { %3592 = vrcp.f32 %v522_v15  ;;  %v3380_v15 = vld [vmem:[%s4640_s13 + $0x8c] sm:$0xf] }
 0x532   :  { %3594 = vrcp.f32 %v647_v14  ;;  %v2780_v14 = vor.u32 %v3388_v11, %v2779_v10  ;;  %v3560_v10 = vld [vmem:[%s4638_s11] ss:$0 sm:$0xff] }
 0x533   :  { %3596 = vrcp.f32 %v650_v13  ;;  %v2776_v13 = vor.u32 %v3379_v7, %v2773_v9 }
 0x534   :  { %3598 = vrcp.f32 %v3628_v55 }
 0x535   :  { %1045 = vmatpush.bf16.msrb.mxu1 %v2776_v13 }
 0x537   :  { %v3593_v16 = vpop.eup %3592 }
 0x538   :  { %v3550_v17 = vpop.permute.xlu1 %3549  ;;  %v526_v18 = vmul.f32 %v3593_v16, %v3585_v60  ;;  %v3595_v20 = vpop.eup %3594 }
 0x539   :  { %v3551_v24 = vunpack.i.l.bf16 %v3550_v17  ;;  %v3552_v26 = vunpack.i.h.bf16 %v3550_v17  ;;  %v653_v27 = vmul.f32 %v3595_v20, %v3581_v52  ;;  %v3597_v28 = vpop.eup %3596  ;;  %v2784_v17 = vor.u32 %v3380_v15, %v2781_v25  ;;  %v3371_v20 = vld [vmem:[%s4640_s13 + $0x3c] sm:$0xf0] }
 0x53a   :  { %2694 = vmatmul.msk.f32.gmra.mxu3 %vm252_vm6, %v526_v18  ;;  %v654_v30 = vmul.f32 %v3597_v28, %v3583_v57  ;;  %v3599_v56 = vpop.eup %3598  ;;  %v2707_v18 = vld [vmem:[%s4640_s13] sm:$0xf]  ;;  %v2709_v28 = vld [vmem:[%s4640_s13 + $0x40] sm:$0xf0] }
 0x53b   :  { %681 = vmatpush.msrb.mxu2 %v3551_v24  ;;  %v737_v57 = vmul.f32 32.0, %v3599_v56  ;;  %vm741_vm7 = vweird.f32 %v3599_v56  ;;  %v3363_v24 = vld [vmem:[%s4640_s13 + $0x4] sm:$0xf]  ;;  %1073 = vmatpush.bf16.msra.mxu3 %v2784_v17  ;;  %v2803_v17 = vld [vmem:[%s4640_s13 + $0xa0] sm:$0xf] }
 0x53d   :  { %682 = vmatpush.msrb.mxu2 %v3552_v26  ;;  %v738_v58 = vsub.f32 1.0, %v737_v57  ;;  %v2731_v57 = vld [vmem:[%s4640_s13 + $0x18] sm:$0xf] }
 0x53e   :  { %2701 = vmatmul.msk.f32.vlgmr.msrb.gmra.mxu2 %vm252_vm6, %v653_v27  ;;  %v2708_v27 = vor.u32 %v3371_v20, %v2707_v18  ;;  %v3383_v18 = vld [vmem:[%s4640_s13 + $0xa4] sm:$0xf] }
 0x53f   :  { %1059 = vmatpush.bf16.msra.mxu2 %v2780_v14  ;;  %v3561_v14 = vld [vmem:[%s4639_s12] ss:$0 sm:$0xff]  ;;  %v2805_v20 = vld [vmem:[%s4640_s13 + $0xe0] sm:$0xf0] }
 0x544   :  { %v401_v29 = vpop.f32.mrf.mxu3 }
 0x545   :  { %2685 = vmatmul.msk.f32.vlgmr.msra.gmra.mxu0 %vm220_vm5, %v401_v29  ;;  %v2715_v29 = vld [vmem:[%s4640_s13 + $0x8] sm:$0xf] }
 0x546   :  { %2702 = vmatmul.msk.f32.gmra.mxu2 %vm252_vm6, %v654_v30  ;;  %1031 = vmatpush.bf16.msra.mxu0 %v2772_v8  ;;  %v2712_v30 = vor.u32 %v3363_v24, %v2709_v28  ;;  %v3384_v28 = vld [vmem:[%s4640_s13 + $0xac] sm:$0xf] }
 0x548   :  { %1046 = vmatpush.bf16.msrb.mxu1 %v2712_v30 }
 0x54a   :  { %1032 = vmatpush.bf16.msra.mxu0 %v2708_v27  ;;  %v3392_v27 = vld [vmem:[%s4640_s13 + $0xe4] sm:$0xf0] }
 0x54c   :  { %v404_v31 = vpop.f32.mrf.mxu3 }
 0x54d   :  { %2686 = vmatmul.msk.f32.gmra.mxu0 %vm220_vm5, %v404_v31  ;;  %v3372_v31 = vld [vmem:[%s4640_s13 + $0x44] sm:$0xf0] }
 0x554   :  { %v556_v32 = vpop.f32.mrf.mxu3 }
 0x555   :  { %2695 = vmatmul.msk.f32.vlgmr.msrb.gmra.mxu0 %vm220_vm5, %v556_v32  ;;  %v3364_v32 = vld [vmem:[%s4640_s13 + $0xc] sm:$0xf] }
 0x5bd   :  { %v559_v35 = vpop.f32.mrf.mxu3 }
 0x5be   :  { %2696 = vmatmul.msk.f32.gmra.mxu0 %vm220_vm5, %v559_v35  ;;  %v2716_v35 = vor.u32 %v3372_v31, %v2715_v29  ;;  %v2813_v29 = vld [vmem:[%s4640_s13 + $0xe8] sm:$0xf0] }
 0x5c0   :  { %1060 = vmatpush.bf16.msra.mxu2 %v2716_v35  ;;  %v3375_v35 = vld [vmem:[%s4640_s13 + $0x5c] sm:$0xf0] }
 0x5c1   :  { %v684_v36 = vpop.f32.mrf.mxu2 }
 0x5c2   :  { %2703 = vmatmul.msk.f32.vlgmr.msrb.gmra.mxu3 %vm220_vm5, %v684_v36  ;;  %v431_v39 = vpop.f32.mrf.mxu0  ;;  %v2720_v36 = vor.u32 %v3364_v32, %v2717_v33  ;;  %v2808_v32 = vor.u32 %v3383_v18, %v2805_v20  ;;  %v2739_v33 = vld [vmem:[%s4640_s13 + $0x20] sm:$0xf] }
 0x5c3   :  { %v461_v42 = vadd.f32 %v3867_v21, %v431_v39  ;;  %v2787_v39 = vld [vmem:[%s4640_s13 + $0x90] sm:$0xf]  ;;  %v3415_v18 = vld [vmem:[%s4641_s15 + $0xa0] sm:$0xff] }
 0x5c4   :  { %1074 = vmatpush.bf16.msra.mxu3 %v2720_v36  ;;  %v3423_v20 = vld [vmem:[%s4641_s15 + $0xe0] sm:$0xff] }
 0x5c9   :  { %v687_v37 = vpop.f32.mrf.mxu2 }
 0x5ca   :  { %2704 = vmatmul.msk.f32.gmra.mxu3 %vm220_vm5, %v687_v37  ;;  %v434_v40 = vpop.f32.mrf.mxu0 }
 0x5cb   :  { %v464_v47 = vadd.f32 %v3869_v22, %v434_v40  ;;  %v739_v22 = vmul.f32 %v3599_v56, %v738_v58  ;;  %v3389_v40 = vld [vmem:[%s4640_s13 + $0xcc] sm:$0xf0]  ;;  %v3374_v58 = vld [vmem:[%s4640_s13 + $0x54] sm:$0xf0] }
 0x5cd   :  { %v740_v59 = vadd.f32 %v3599_v56, %v739_v22 }
 0x5d2   :  { %v586_v41 = vpop.f32.mrf.mxu0 }
 0x5d3   :  { %v592_v43 = vadd.f32 %v586_v41, %v461_v42  ;;  %v3381_v41 = vld [vmem:[%s4640_s13 + $0x94] sm:$0xf] }
 0x63b   :  { %v589_v38 = vpop.f32.mrf.mxu0 }
 0x63c   :  { %v593_v49 = vadd.f32 %v589_v38, %v464_v47  ;;  %v3382_v47 = vld [vmem:[%s4640_s13 + $0x9c] sm:$0xf] }
 0x645   :  { %v714_v44 = vpop.f32.mrf.mxu3 }
 0x646   :  { %v720_v45 = vadd.f32 %v714_v44, %v592_v43  ;;  %v2788_v43 = vor.u32 %v3389_v40, %v2787_v39  ;;  %v2795_v44 = vld [vmem:[%s4640_s13 + $0x98] sm:$0xf]  ;;  %v3367_v39 = vld [vmem:[%s4640_s13 + $0x24] sm:$0xf] }
 0x647   :  { %v2741_v40 = vld [vmem:[%s4640_s13 + $0x60] sm:$0xf0] }
 0x648   :  { %v726_v46 = vadd.f32 %v3559_v34, %v720_v45  ;;  %v3390_v45 = vld [vmem:[%s4640_s13 + $0xd4] sm:$0xf0]  ;;  %1087 = vmatpush.bf16.msrb.mxu0 %v2788_v43  ;;  %v3368_v43 = vld [vmem:[%s4640_s13 + $0x2c] sm:$0xf] }
 0x649   :  { %v2796_v38 = vor.u32 %v3390_v45, %v2795_v44  ;;  %v2740_v44 = vor.u32 %v3375_v35, %v2739_v33  ;;  %v2744_v45 = vor.u32 %v3367_v39, %v2741_v40  ;;  %v3413_v33 = vld [vmem:[%s4641_s15 + $0x90] sm:$0xff]  ;;  %v3396_v35 = vld [vmem:[%s4641_s15 + $0x8] sm:$0xff]  ;;  %v3395_v40 = vld [vmem:[%s4641_s15] sm:$0xff] }
 0x64a   :  { %v728_v48 = vadd.f32 %v726_v46, %v3785_v19  ;;  %v3914_v19 = vsel %vm741_vm7, %v3599_v56, %v740_v59  ;;  %v2725_v56 = vld [vmem:[%s4640_s13 + $0x50] sm:$0xf0]  ;;  %v2732_v59 = vor.u32 %v3374_v58, %v2731_v57  ;;  %v3377_v57 = vld [vmem:[%s4640_s13 + $0x6c] sm:$0xf0]  ;;  %v3420_v39 = vld [vmem:[%s4641_s15 + $0xc8] sm:$0xff] }
 0x64b   :  { %1115 = vmatpush.bf16.msrb.mxu2 %v2796_v38 }
 0x64c   :  { %v730_v50 = vsel %vm174_vm4, %v728_v48, 0.0 }
 0x64d   :  { %731 = vadd.xlane.f32.xlu0 %v730_v50  ;;  %v717_v51 = vpop.f32.mrf.mxu3 }
 0x64e   :  { %v721_v52 = vadd.f32 %v717_v51, %v593_v49  ;;  %v2723_v49 = vld [vmem:[%s4640_s13 + $0x10] sm:$0xf] }
 0x64f   :  { %1116 = vmatpush.bf16.msrb.mxu2 %v2732_v59  ;;  %v3369_v59 = vld [vmem:[%s4640_s13 + $0x34] sm:$0xf] }
 0x650   :  { %v727_v21 = vadd.f32 %v3559_v34, %v721_v52  ;;  %v2789_v34 = vld [vmem:[%s4640_s13 + $0xd0] sm:$0xf0] }
 0x651   :  { %v2792_v46 = vor.u32 %v3381_v41, %v2789_v34  ;;  %v2747_v41 = vld [vmem:[%s4640_s13 + $0x28] sm:$0xf]  ;;  %v2749_v34 = vld [vmem:[%s4640_s13 + $0x68] sm:$0xf0] }
 0x652   :  { %v729_v53 = vadd.f32 %v727_v21, %v3791_v23  ;;  %v3373_v21 = vld [vmem:[%s4640_s13 + $0x4c] sm:$0xf0]  ;;  %v2752_v38 = vor.u32 %v3368_v43, %v2749_v34  ;;  %v3442_v43 = vld [vmem:[%s4641_s15 + $0x178] sm:$0xff]  ;;  %v3411_v34 = vld [vmem:[%s4641_s15 + $0x80] sm:$0xff] }
 0x653   :  { %1101 = vmatpush.bf16.msra.mxu1 %v2792_v46  ;;  %v2724_v55 = vor.u32 %v3373_v21, %v2723_v49  ;;  %v3385_v49 = vld [vmem:[%s4640_s13 + $0xb4] sm:$0xf]  ;;  %v3386_v21 = vld [vmem:[%s4640_s13 + $0xbc] sm:$0xf] }
 0x654   :  { %v733_v54 = vsel %vm174_vm4, %v729_v53, 0.0 }
 0x655   :  { %734 = vadd.xlane.f32.xlu2 %v733_v54  ;;  %1088 = vmatpush.bf16.msrb.mxu0 %v2724_v55 }
 0x6c0   :  { %v732_v60 = vpop.xlane.xlu0 %731 }
 0x6c1   :  { %v743_v61 = vmul.f32 %v3914_v19, %v732_v60  ;;  %v3366_v60 = vld [vmem:[%s4640_s13 + $0x1c] sm:$0xf] }
 0x6c3   :  { %v3917_v62 = vsub.f32 %v728_v48, %v743_v61  ;;  %v2797_v48 = vld [vmem:[%s4640_s13 + $0xd8] sm:$0xf0] }
 0x6c4   :  { %v2800_v52 = vor.u32 %v3382_v47, %v2797_v48  ;;  %v2733_v61 = vld [vmem:[%s4640_s13 + $0x58] sm:$0xf0]  ;;  %v2819_v47 = vld [vmem:[%s4640_s13 + $0xb0] sm:$0xf] }
 0x6c5   :  { %v747_v23 = vmul.f32 %v3917_v62, %v3917_v62  ;;  %v3393_v48 = vld [vmem:[%s4640_s13 + $0xec] sm:$0xf0] }
 0x6c6   :  { %1129 = vmatpush.bf16.msrb.mxu3 %v2800_v52  ;;  %v3394_v52 = vld [vmem:[%s4640_s13 + $0xf4] sm:$0xf0] }
 0x6c7   :  { %v749_v63 = vsel %vm174_vm4, %v747_v23, 0.0 }
 0x6c8   :  { %750 = vadd.xlane.f32.xlu1 %v749_v63  ;;  %v735_v0 = vpop.xlane.xlu2 %734  ;;  %v2736_v63 = vor.u32 %v3366_v60, %v2733_v61  ;;  %v2757_v60 = vld [vmem:[%s4640_s13 + $0x70] sm:$0xf0]  ;;  %v2763_v61 = vld [vmem:[%s4640_s13 + $0x38] sm:$0xf] }
 0x6c9   :  { %v744_v1 = vmul.f32 %v3914_v19, %v735_v0 }
 0x6ca   :  { %1130 = vmatpush.bf16.msrb.mxu3 %v2736_v63  ;;  %v3370_v63 = vld [vmem:[%s4640_s13 + $0x3c] sm:$0xf] }
 0x6cb   :  { %v3923_v2 = vsub.f32 %v729_v53, %v744_v1  ;;  %v3365_v53 = vld [vmem:[%s4640_s13 + $0x14] sm:$0xf] }
 0x6cc   :  { %v2728_v22 = vor.u32 %v3365_v53, %v2725_v56  ;;  %v2829_v53 = vld [vmem:[%s4640_s13 + $0xf8] sm:$0xf0]  ;;  %v2755_v56 = vld [vmem:[%s4640_s13 + $0x30] sm:$0xf] }
 0x6cd   :  { %v748_v3 = vmul.f32 %v3923_v2, %v3923_v2 }
 0x6ce   :  { %1102 = vmatpush.bf16.msra.mxu1 %v2728_v22  ;;  %v2832_v22 = vor.u32 %v3386_v21, %v2829_v53  ;;  %v3439_v21 = vld [vmem:[%s4641_s15 + $0x160] sm:$0xff]  ;;  %v3448_v53 = vld [vmem:[%s4641_s15 + $0x1a8] sm:$0xff] }
 0x6cf   :  { %v752_v4 = vsel %vm174_vm4, %v748_v3, 0.0 }
 0x6d0   :  { %753 = vadd.xlane.f32.xlu2 %v752_v4 }
 0x73b   :  { %v751_v12 = vpop.xlane.xlu1 %750 }
 0x73c   :  { %v755_v16 = vmul.f32 %v751_v12, %v3914_v19 }
 0x73e   :  { %v3962_v26 = vadd.f32 1e-05, %v755_v16 }
 0x740   :  { %3600 = vrsqrt.f32 %v3962_v26  ;;  %vm765_vm9 = vweird.f32 %v3962_v26 }
 0x743   :  { %v754_v37 = vpop.xlane.xlu2 %753 }
 0x744   :  { %v756_v42 = vmul.f32 %v754_v37, %v3914_v19  ;;  %v2816_v37 = vor.u32 %v3384_v28, %v2813_v29  ;;  %v3414_v28 = vld [vmem:[%s4641_s15 + $0x98] sm:$0xff] }
 0x745   :  { %v3422_v29 = vld [vmem:[%s4641_s15 + $0xd8] sm:$0xff] }
 0x746   :  { %v3601_v50 = vpop.eup %3600  ;;  %v758_v51 = vadd.f32 1e-05, %v756_v42  ;;  %v3376_v42 = vld [vmem:[%s4640_s13 + $0x64] sm:$0xf0] }
 0x747   :  { %v760_v54 = vmul.f32 %v3601_v50, %v3962_v26  ;;  %vm766_vm8 = vweird.f32 %v3601_v50  ;;  %v2748_v46 = vor.u32 %v3376_v42, %v2747_v41  ;;  %v3403_v41 = vld [vmem:[%s4641_s15 + $0x40] sm:$0xff]  ;;  %v3434_v42 = vld [vmem:[%s4641_s15 + $0x138] sm:$0xff] }
 0x748   :  { %3602 = vrsqrt.f32 %v758_v51  ;;  %vm767_vm10 = vmor %vm765_vm9, %vm766_vm8  ;;  %vm775_vm12 = vweird.f32 %v758_v51 }
 0x749   :  { %v761_v23 = vmul.f32 %v3601_v50, %v760_v54  ;;  %v2820_v54 = vor.u32 %v3393_v48, %v2819_v47  ;;  %v3441_v47 = vld [vmem:[%s4641_s15 + $0x170] sm:$0xff] }
 0x74a   :  { %v3449_v48 = vld [vmem:[%s4641_s15 + $0x1b0] sm:$0xff] }
 0x74b   :  { %v762_v0 = vmul.f32 0.5, %v761_v23  ;;  %v3378_v23 = vld [vmem:[%s4640_s13 + $0x74] sm:$0xf0] }
 0x74d   :  { %v763_v1 = vsub.f32 1.5, %v762_v0  ;;  %v2765_v0 = vld [vmem:[%s4640_s13 + $0x78] sm:$0xf0] }
 0x74e   :  { %v3603_v3 = vpop.eup %3602 }
 0x74f   :  { %v764_v4 = vmul.f32 %v3601_v50, %v763_v1  ;;  %v770_v5 = vmul.f32 %v3603_v3, %v758_v51  ;;  %vm776_vm11 = vweird.f32 %v3603_v3  ;;  %v2827_v51 = vld [vmem:[%s4640_s13 + $0xb8] sm:$0xf]  ;;  %v2756_v1 = vor.u32 %v3377_v57, %v2755_v56  ;;  %v3447_v57 = vld [vmem:[%s4641_s15 + $0x1a0] sm:$0xff] }
 0x750   :  { %vm777_vm13 = vmor %vm775_vm12, %vm776_vm11  ;;  %v2828_v58 = vor.u32 %v3394_v52, %v2827_v51  ;;  %v3440_v51 = vld [vmem:[%s4641_s15 + $0x168] sm:$0xff]  ;;  %v3431_v52 = vld [vmem:[%s4641_s15 + $0x120] sm:$0xff] }
 0x751   :  { %v771_v6 = vmul.f32 %v3603_v3, %v770_v5  ;;  %v768_v7 = vsel %vm767_vm10, %v3601_v50, %v764_v4  ;;  %v2821_v50 = vld [vmem:[%s4640_s13 + $0xf0] sm:$0xf0]  ;;  %v2764_v4 = vor.u32 %v3378_v23, %v2763_v61  ;;  %v2768_v5 = vor.u32 %v3370_v63, %v2765_v0  ;;  %v3438_v56 = vld [vmem:[%s4641_s15 + $0x158] sm:$0xff]  ;;  %v3428_v23 = vld [vmem:[%s4641_s15 + $0x108] sm:$0xff] }
 0x752   :  { %v779_v11 = vmul.f32 %v768_v7, %v3917_v62  ;;  %v3391_v62 = vld [vmem:[%s4640_s13 + $0xdc] sm:$0xf0]  ;;  %v2824_v55 = vor.u32 %v3385_v49, %v2821_v50  ;;  %v3410_v7 = vld [vmem:[%s4641_s15 + $0x78] sm:$0xff]  ;;  %v3457_v49 = vld [vmem:[%s4641_s15 + $0x1f0] sm:$0xff] }
 0x753   :  { %v772_v8 = vmul.f32 0.5, %v771_v6  ;;  %v2804_v31 = vor.u32 %v3391_v62, %v2803_v17  ;;  %v3402_v6 = vld [vmem:[%s4641_s15 + $0x38] sm:$0xff]  ;;  %v3399_v17 = vld [vmem:[%s4641_s15 + $0x20] sm:$0xff]  ;;  %v3432_v50 = vld [vmem:[%s4641_s15 + $0x128] sm:$0xff] }
 0x754   :  { %v785_v15 = vmul.f32 %v3560_v10, %v779_v11  ;;  %v3409_v11 = vld [vmem:[%s4641_s15 + $0x70] sm:$0xff]  ;;  %v3407_v62 = vld [vmem:[%s4641_s15 + $0x60] sm:$0xff]  ;;  %v3454_v61 = vld [vmem:[%s4641_s15 + $0x1d8] sm:$0xff] }
 0x755   :  { %v773_v9 = vsub.f32 1.5, %v772_v8  ;;  %v3418_v8 = vld [vmem:[%s4641_s15 + $0xb8] sm:$0xff]  ;;  %v3436_v63 = vld [vmem:[%s4641_s15 + $0x148] sm:$0xff]  ;;  %v3445_v0 = vld [vmem:[%s4641_s15 + $0x190] sm:$0xff] }
 0x756   :  { %v4054_v24 = vadd.f32 %v3561_v14, %v785_v15  ;;  %v3408_v15 = vld [vmem:[%s4641_s15 + $0x68] sm:$0xff] }
 0x757   :  { %v774_v12 = vmul.f32 %v3603_v3, %v773_v9  ;;  %v3426_v9 = vld [vmem:[%s4641_s15 + $0xf8] sm:$0xff] }
 0x759   :  { %v778_v13 = vsel %vm777_vm13, %v3603_v3, %v774_v12  ;;  %v2760_v3 = vor.u32 %v3369_v59, %v2757_v60  ;;  %v3417_v12 = vld [vmem:[%s4641_s15 + $0xb0] sm:$0xff]  ;;  %v3446_v60 = vld [vmem:[%s4641_s15 + $0x198] sm:$0xff] }
 0x75a   :  { %v780_v25 = vmul.f32 %v778_v13, %v3923_v2  ;;  %v2811_v2 = vld [vmem:[%s4640_s13 + $0xa8] sm:$0xf]  ;;  %v3425_v13 = vld [vmem:[%s4641_s15 + $0xf0] sm:$0xff] }
 0x75b   :  { %v2812_v36 = vor.u32 %v3392_v27, %v2811_v2  ;;  %v3398_v2 = vld [vmem:[%s4641_s15 + $0x18] sm:$0xff]  ;;  %v3437_v59 = vld [vmem:[%s4641_s15 + $0x150] sm:$0xff] }
 0x75c   :  { %v786_v16 = vmul.f32 %v3560_v10, %v780_v25  ;;  %v3401_v10 = vld [vmem:[%s4641_s15 + $0x30] sm:$0xff]  ;;  %v3416_v25 = vld [vmem:[%s4641_s15 + $0xa8] sm:$0xff]  ;;  %v3406_v27 = vld [vmem:[%s4641_s15 + $0x58] sm:$0xff] }
 0x75e   :  { %v4056_v26 = vadd.f32 %v3561_v14, %v786_v16  ;;  %v3400_v14 = vld [vmem:[%s4641_s15 + $0x28] sm:$0xff] }
 0x75f   :  { %v3424_v16 = vld [vmem:[%s4641_s15 + $0xe8] sm:$0xff] }
 0x760   :  { %v4069_v30 = vpack.c.bf16 %v4056_v26, %v4054_v24 }
 0x762   :  { %2833 = vmatmul.msk.bf16.vlgmr.msra.gmra.mxu0 %vm174_vm4, %v4069_v30  ;;  %2834 = vmatmul.msk.bf16.vlgmr.msrb.gmra.mxu1 %vm174_vm4, %v4069_v30 }
 0x763   :  { %2835 = vmatmul.msk.bf16.vlgmr.msra.gmra.mxu2 %vm174_vm4, %v4069_v30  ;;  %2836 = vmatmul.msk.bf16.vlgmr.msra.gmra.mxu3 %vm174_vm4, %v4069_v30 }
 0x764   :  { %1143 = vmatpush.bf16.msra.mxu0 %v2804_v31  ;;  %1157 = vmatpush.bf16.msrb.mxu1 %v2808_v32  ;;  %v3397_v31 = vld [vmem:[%s4641_s15 + $0x10] sm:$0xff] }
 0x765   :  { %1171 = vmatpush.bf16.msra.mxu2 %v2812_v36  ;;  %1185 = vmatpush.bf16.msra.mxu3 %v2816_v37  ;;  %v3405_v32 = vld [vmem:[%s4641_s15 + $0x50] sm:$0xff]  ;;  %v3404_v36 = vld [vmem:[%s4641_s15 + $0x48] sm:$0xff] }
 0x766   :  { %v3412_v37 = vld [vmem:[%s4641_s15 + $0x88] sm:$0xff] }
 0x768   :  { %1144 = vmatpush.bf16.msra.mxu0 %v2740_v44  ;;  %1158 = vmatpush.bf16.msrb.mxu1 %v2744_v45  ;;  %v3419_v44 = vld [vmem:[%s4641_s15 + $0xc0] sm:$0xff]  ;;  %v3450_v45 = vld [vmem:[%s4641_s15 + $0x1b8] sm:$0xff] }
 0x769   :  { %1172 = vmatpush.bf16.msra.mxu2 %v2748_v46  ;;  %1186 = vmatpush.bf16.msra.mxu3 %v2752_v38  ;;  %v3458_v46 = vld [vmem:[%s4641_s15 + $0x1f8] sm:$0xff]  ;;  %v3433_v38 = vld [vmem:[%s4641_s15 + $0x130] sm:$0xff] }
 0x772   :  { %2837 = vmatmul.msk.bf16.vlgmr.msrb.gmra.mxu0 %vm174_vm4, %v4069_v30  ;;  %2838 = vmatmul.msk.bf16.vlgmr.msra.gmra.mxu1 %vm174_vm4, %v4069_v30 }
 0x773   :  { %2839 = vmatmul.msk.bf16.vlgmr.msrb.gmra.mxu2 %vm174_vm4, %v4069_v30  ;;  %2840 = vmatmul.msk.bf16.vlgmr.msrb.gmra.mxu3 %vm174_vm4, %v4069_v30 }
 0x774   :  { %1199 = vmatpush.bf16.msrb.mxu0 %v2820_v54  ;;  %1213 = vmatpush.bf16.msra.mxu1 %v2824_v55  ;;  %v3456_v54 = vld [vmem:[%s4641_s15 + $0x1e8] sm:$0xff]  ;;  %v3430_v55 = vld [vmem:[%s4641_s15 + $0x118] sm:$0xff] }
 0x775   :  { %1227 = vmatpush.bf16.msrb.mxu2 %v2828_v58  ;;  %1241 = vmatpush.bf16.msrb.mxu3 %v2832_v22  ;;  %v3455_v58 = vld [vmem:[%s4641_s15 + $0x1e0] sm:$0xff]  ;;  %v3429_v22 = vld [vmem:[%s4641_s15 + $0x110] sm:$0xff] }
 0x778   :  { %1200 = vmatpush.bf16.msrb.mxu0 %v2756_v1  ;;  %1214 = vmatpush.bf16.msra.mxu1 %v2760_v3  ;;  %v3453_v1 = vld [vmem:[%s4641_s15 + $0x1d0] sm:$0xff]  ;;  %v3427_v3 = vld [vmem:[%s4641_s15 + $0x100] sm:$0xff] }
 0x779   :  { %1228 = vmatpush.bf16.msrb.mxu2 %v2764_v4  ;;  %1242 = vmatpush.bf16.msrb.mxu3 %v2768_v5  ;;  %v3435_v4 = vld [vmem:[%s4641_s15 + $0x140] sm:$0xff]  ;;  %v3444_v5 = vld [vmem:[%s4641_s15 + $0x188] sm:$0xff] }
 0x782   :  { %2841 = vmatmul.msk.bf16.vlgmr.msra.gmra.mxu0 %vm174_vm4, %v4069_v30  ;;  %2842 = vmatmul.msk.bf16.vlgmr.msrb.gmra.mxu1 %vm174_vm4, %v4069_v30 }
 0x783   :  { %2843 = vmatmul.msk.bf16.vlgmr.msra.gmra.mxu2 %vm174_vm4, %v4069_v30  ;;  %2844 = vmatmul.msk.bf16.vlgmr.msra.gmra.mxu3 %vm174_vm4, %v4069_v30 }
 0x784   :  { %2325 = vmatpush.bf16.msra.mxu0 %v3402_v6  ;;  %2339 = vmatpush.bf16.msrb.mxu1 %v3410_v7  ;;  %v3452_v6 = vld [vmem:[%s4641_s15 + $0x1c8] sm:$0xff]  ;;  %v3443_v7 = vld [vmem:[%s4641_s15 + $0x180] sm:$0xff] }
 0x785   :  { %2353 = vmatpush.bf16.msra.mxu2 %v3418_v8  ;;  %2367 = vmatpush.bf16.msra.mxu3 %v3426_v9  ;;  %v3451_v8 = vld [vmem:[%s4641_s15 + $0x1c0] sm:$0xff] }
 0x786   :  { %v4370_v9 = vld [vmem:[%s4643_s14] sm:$0xff] }
 0x788   :  { %2326 = vmatpush.bf16.msra.mxu0 %v3401_v10  ;;  %2340 = vmatpush.bf16.msrb.mxu1 %v3409_v11 }
 0x789   :  { %2354 = vmatpush.bf16.msra.mxu2 %v3417_v12  ;;  %2368 = vmatpush.bf16.msra.mxu3 %v3425_v13  ;;  %v830_v12 = vperm.slane %v4370_v9, 0  ;;  %v831_v13 = vperm.slane %v4370_v9, 1 }
 0x78c   :  { %2327 = vmatpush.bf16.msra.mxu0 %v3400_v14  ;;  %2341 = vmatpush.bf16.msrb.mxu1 %v3408_v15 }
 0x78d   :  { %2355 = vmatpush.bf16.msra.mxu2 %v3416_v25  ;;  %2369 = vmatpush.bf16.msra.mxu3 %v3424_v16 }
 0x790   :  { %2328 = vmatpush.bf16.msra.mxu0 %v3399_v17  ;;  %2342 = vmatpush.bf16.msrb.mxu1 %v3407_v62 }
 0x791   :  { %2356 = vmatpush.bf16.msra.mxu2 %v3415_v18  ;;  %2370 = vmatpush.bf16.msra.mxu3 %v3423_v20 }
 0x792   :  { %2845 = vmatmul.msk.bf16.vlgmr.msrb.gmra.mxu0 %vm174_vm4, %v4069_v30  ;;  %2846 = vmatmul.msk.bf16.vlgmr.msra.gmra.mxu1 %vm174_vm4, %v4069_v30 }
 0x793   :  { %2847 = vmatmul.msk.bf16.vlgmr.msrb.gmra.mxu2 %vm174_vm4, %v4069_v30  ;;  %2848 = vmatmul.msk.bf16.vlgmr.msrb.gmra.mxu3 %vm174_vm4, %v4069_v30  ;;  %v3421_v30 = vld [vmem:[%s4641_s15 + $0xd0] sm:$0xff] }
 0x794   :  { %2329 = vmatpush.bf16.msra.mxu0 %v3398_v2  ;;  %2343 = vmatpush.bf16.msrb.mxu1 %v3406_v27  ;;  %v832_v2 = vperm.slane %v4370_v9, 2  ;;  %v833_v27 = vperm.slane %v4370_v9, 3 }
 0x795   :  { %2357 = vmatpush.bf16.msra.mxu2 %v3414_v28  ;;  %2371 = vmatpush.bf16.msra.mxu3 %v3422_v29 }
 0x798   :  { %2330 = vmatpush.bf16.msra.mxu0 %v3397_v31  ;;  %2344 = vmatpush.bf16.msrb.mxu1 %v3405_v32 }
 0x799   :  { %2358 = vmatpush.bf16.msra.mxu2 %v3413_v33  ;;  %2372 = vmatpush.bf16.msra.mxu3 %v3421_v30  ;;  %v3466_v33 = vld [vmem:[%s4641_s15 + $0x238] sm:$0xff] }
 0x79a   :  { %v3474_v30 = vld [vmem:[%s4641_s15 + $0x278] sm:$0xff] }
 0x79c   :  { %2331 = vmatpush.bf16.msra.mxu0 %v3396_v35  ;;  %2345 = vmatpush.bf16.msrb.mxu1 %v3404_v36 }
 0x79d   :  { %2359 = vmatpush.bf16.msra.mxu2 %v3412_v37  ;;  %2373 = vmatpush.bf16.msra.mxu3 %v3420_v39 }
 0x7a0   :  { %2332 = vmatpush.bf16.msra.mxu0 %v3395_v40  ;;  %2346 = vmatpush.bf16.msrb.mxu1 %v3403_v41 }
 0x7a1   :  { %2360 = vmatpush.bf16.msra.mxu2 %v3411_v34  ;;  %2374 = vmatpush.bf16.msra.mxu3 %v3419_v44 }
 0x7a4   :  { %2381 = vmatpush.bf16.msrb.mxu0 %v3434_v42  ;;  %2395 = vmatpush.bf16.msra.mxu1 %v3442_v43 }
 0x7a5   :  { %2409 = vmatpush.bf16.msrb.mxu2 %v3450_v45  ;;  %2423 = vmatpush.bf16.msrb.mxu3 %v3458_v46  ;;  %v3465_v45 = vld [vmem:[%s4641_s15 + $0x230] sm:$0xff] }
 0x7a6   :  { %v3473_v46 = vld [vmem:[%s4641_s15 + $0x270] sm:$0xff] }
 0x7a8   :  { %2382 = vmatpush.bf16.msrb.mxu0 %v3433_v38  ;;  %2396 = vmatpush.bf16.msra.mxu1 %v3441_v47 }
 0x7a9   :  { %2410 = vmatpush.bf16.msrb.mxu2 %v3449_v48  ;;  %2424 = vmatpush.bf16.msrb.mxu3 %v3457_v49 }
 0x7ac   :  { %2383 = vmatpush.bf16.msrb.mxu0 %v3432_v50  ;;  %2397 = vmatpush.bf16.msra.mxu1 %v3440_v51  ;;  %v834_v50 = vperm.slane %v4370_v9, 4  ;;  %v835_v51 = vperm.slane %v4370_v9, 5 }
 0x7ad   :  { %2411 = vmatpush.bf16.msrb.mxu2 %v3448_v53  ;;  %2425 = vmatpush.bf16.msrb.mxu3 %v3456_v54 }
 0x7b0   :  { %2384 = vmatpush.bf16.msrb.mxu0 %v3431_v52  ;;  %2398 = vmatpush.bf16.msra.mxu1 %v3439_v21  ;;  %v3482_v52 = vld [vmem:[%s4641_s15 + $0x2b8] sm:$0xff] }
 0x7b1   :  { %2412 = vmatpush.bf16.msrb.mxu2 %v3447_v57  ;;  %2426 = vmatpush.bf16.msrb.mxu3 %v3455_v58  ;;  %v3490_v21 = vld [vmem:[%s4641_s15 + $0x2f8] sm:$0xff] }
 0x7b4   :  { %2385 = vmatpush.bf16.msrb.mxu0 %v3430_v55  ;;  %2399 = vmatpush.bf16.msra.mxu1 %v3438_v56  ;;  %v3464_v55 = vld [vmem:[%s4641_s15 + $0x228] sm:$0xff] }
 0x7b5   :  { %2413 = vmatpush.bf16.msrb.mxu2 %v3446_v60  ;;  %2427 = vmatpush.bf16.msrb.mxu3 %v3454_v61  ;;  %v3472_v56 = vld [vmem:[%s4641_s15 + $0x268] sm:$0xff]  ;;  %v3481_v60 = vld [vmem:[%s4641_s15 + $0x2b0] sm:$0xff] }
 0x7b6   :  { %v3489_v61 = vld [vmem:[%s4641_s15 + $0x2f0] sm:$0xff] }
 0x7b8   :  { %2386 = vmatpush.bf16.msrb.mxu0 %v3429_v22  ;;  %2400 = vmatpush.bf16.msra.mxu1 %v3437_v59 }
 0x7b9   :  { %2414 = vmatpush.bf16.msrb.mxu2 %v3445_v0  ;;  %2428 = vmatpush.bf16.msrb.mxu3 %v3453_v1  ;;  %v3463_v0 = vld [vmem:[%s4641_s15 + $0x220] sm:$0xff] }
 0x7ba   :  { %v3471_v1 = vld [vmem:[%s4641_s15 + $0x260] sm:$0xff] }
 0x7bc   :  { %2387 = vmatpush.bf16.msrb.mxu0 %v3428_v23  ;;  %2401 = vmatpush.bf16.msra.mxu1 %v3436_v63 }
 0x7bd   :  { %2415 = vmatpush.bf16.msrb.mxu2 %v3444_v5  ;;  %2429 = vmatpush.bf16.msrb.mxu3 %v3452_v6  ;;  %v836_v5 = vperm.slane %v4370_v9, 6  ;;  %v837_v6 = vperm.slane %v4370_v9, 7  ;;  %v3462_v9 = vld [vmem:[%s4641_s15 + $0x218] sm:$0xff] }
 0x7c0   :  { %2388 = vmatpush.bf16.msrb.mxu0 %v3427_v3  ;;  %2402 = vmatpush.bf16.msra.mxu1 %v3435_v4 }
 0x7c1   :  { %2416 = vmatpush.bf16.msrb.mxu2 %v3443_v7  ;;  %2430 = vmatpush.bf16.msrb.mxu3 %v3451_v8 }
 0x7df   :  { %v1034_v10 = vpop.f32.mrf.mxu0  ;;  %v1048_v11 = vpop.f32.mrf.mxu1 }
 0x7e0   :  { %v1035_v14 = vadd.f32 %v1034_v10, %v830_v12  ;;  %v1049_v15 = vadd.f32 %v1048_v11, %v831_v13 }
 0x7e2   :  { %v1249_v28 = vmax.f32 %v1035_v14, 0.0  ;;  %v1250_v29 = vmax.f32 %v1049_v15, 0.0 }
 0x7e6   :  { %v1062_v25 = vpop.f32.mrf.mxu2  ;;  %v1076_v16 = vpop.f32.mrf.mxu3 }
 0x7e7   :  { %v1036_v17 = vpop.f32.mrf.mxu0  ;;  %v1050_v62 = vpop.f32.mrf.mxu1  ;;  %v1063_v37 = vadd.f32 %v1062_v25, %v832_v2  ;;  %v1077_v39 = vadd.f32 %v1076_v16, %v833_v27  ;;  %v3470_v25 = vld [vmem:[%s4641_s15 + $0x258] sm:$0xff] }
 0x7e8   :  { %v1037_v18 = vadd.f32 %v1036_v17, %v830_v12  ;;  %v1051_v20 = vadd.f32 %v1050_v62, %v831_v13  ;;  %v3480_v12 = vld [vmem:[%s4641_s15 + $0x2a8] sm:$0xff] }
 0x7e9   :  { %v1251_v38 = vmax.f32 %v1063_v37, 0.0  ;;  %v1252_v47 = vmax.f32 %v1077_v39, 0.0  ;;  %v3488_v13 = vld [vmem:[%s4641_s15 + $0x2e8] sm:$0xff] }
 0x7ea   :  { %v1265_v31 = vmax.f32 %v1037_v18, 0.0  ;;  %v1266_v32 = vmax.f32 %v1051_v20, 0.0  ;;  %v3479_v20 = vld [vmem:[%s4641_s15 + $0x2a0] sm:$0xff] }
 0x7ec   :  { %v1281_v35 = vpack.c.bf16 %v1265_v31, %v1249_v28  ;;  %v1282_v36 = vpack.c.bf16 %v1266_v32, %v1250_v29  ;;  %v4437_v29 = vld [vmem:[%s4643_s14 + $0x8] sm:$0xff] }
 0x7ee   :  { %v1064_v40 = vpop.f32.mrf.mxu2  ;;  %v1078_v41 = vpop.f32.mrf.mxu3  ;;  %2333 = vmatmul.bf16.vlgmr.msra.gmra.mxu0 %v1281_v35  ;;  %2347 = vmatmul.bf16.vlgmr.msrb.gmra.mxu1 %v1282_v36 }
 0x7ef   :  { %v1065_v42 = vadd.f32 %v1064_v40, %v832_v2  ;;  %v1079_v43 = vadd.f32 %v1078_v41, %v833_v27  ;;  %2437 = vmatpush.bf16.msra.mxu0 %v3466_v33  ;;  %2451 = vmatpush.bf16.msrb.mxu1 %v3474_v30  ;;  %v1090_v34 = vpop.f32.mrf.mxu0  ;;  %v1104_v44 = vpop.f32.mrf.mxu1  ;;  %v3487_v2 = vld [vmem:[%s4641_s15 + $0x2e0] sm:$0xff]  ;;  %v3461_v33 = vld [vmem:[%s4641_s15 + $0x210] sm:$0xff]  ;;  %v838_v40 = vperm.slane %v4437_v29, 0  ;;  %v839_v41 = vperm.slane %v4437_v29, 1 }
 0x7f0   :  { %v1091_v57 = vadd.f32 %v1090_v34, %v834_v50  ;;  %v1105_v58 = vadd.f32 %v1104_v44, %v835_v51  ;;  %v3469_v30 = vld [vmem:[%s4641_s15 + $0x250] sm:$0xff] }
 0x7f1   :  { %v1267_v48 = vmax.f32 %v1065_v42, 0.0  ;;  %v1268_v49 = vmax.f32 %v1079_v43, 0.0  ;;  %v3478_v42 = vld [vmem:[%s4641_s15 + $0x298] sm:$0xff] }
 0x7f2   :  { %v1253_v7 = vmax.f32 %v1091_v57, 0.0  ;;  %v1254_v8 = vmax.f32 %v1105_v58, 0.0  ;;  %v3486_v43 = vld [vmem:[%s4641_s15 + $0x2d8] sm:$0xff]  ;;  %v840_v57 = vperm.slane %v4437_v29, 2  ;;  %v841_v58 = vperm.slane %v4437_v29, 3 }
 0x7f3   :  { %v1283_v53 = vpack.c.bf16 %v1267_v48, %v1251_v38  ;;  %v1284_v54 = vpack.c.bf16 %v1268_v49, %v1252_v47  ;;  %2438 = vmatpush.bf16.msra.mxu0 %v3465_v45  ;;  %2452 = vmatpush.bf16.msrb.mxu1 %v3473_v46  ;;  %v3460_v45 = vld [vmem:[%s4641_s15 + $0x208] sm:$0xff] }
 0x7f4   :  { %v3468_v46 = vld [vmem:[%s4641_s15 + $0x248] sm:$0xff] }
 0x7f5   :  { %2361 = vmatmul.bf16.vlgmr.msra.gmra.mxu2 %v1283_v53  ;;  %2375 = vmatmul.bf16.vlgmr.msra.gmra.mxu3 %v1284_v54 }
 0x7f6   :  { %2465 = vmatpush.bf16.msra.mxu2 %v3482_v52  ;;  %2479 = vmatpush.bf16.msra.mxu3 %v3490_v21  ;;  %v1118_v22 = vpop.f32.mrf.mxu2  ;;  %v1132_v59 = vpop.f32.mrf.mxu3 }
 0x7f7   :  { %2439 = vmatpush.bf16.msra.mxu0 %v3464_v55  ;;  %2453 = vmatpush.bf16.msrb.mxu1 %v3472_v56  ;;  %v1092_v23 = vpop.f32.mrf.mxu0  ;;  %v1106_v63 = vpop.f32.mrf.mxu1  ;;  %v1119_v16 = vadd.f32 %v1118_v22, %v836_v5  ;;  %v1133_v17 = vadd.f32 %v1132_v59, %v837_v6  ;;  %v3459_v55 = vld [vmem:[%s4641_s15 + $0x200] sm:$0xff]  ;;  %v3498_v22 = vld [vmem:[%s4641_s15 + $0x338] sm:$0xff] }
 0x7f8   :  { %v1093_v3 = vadd.f32 %v1092_v23, %v834_v50  ;;  %v1107_v4 = vadd.f32 %v1106_v63, %v835_v51  ;;  %v3477_v50 = vld [vmem:[%s4641_s15 + $0x290] sm:$0xff]  ;;  %v3467_v56 = vld [vmem:[%s4641_s15 + $0x240] sm:$0xff]  ;;  %v3506_v59 = vld [vmem:[%s4641_s15 + $0x378] sm:$0xff] }
 0x7f9   :  { %v1255_v35 = vmax.f32 %v1119_v16, 0.0  ;;  %v1256_v36 = vmax.f32 %v1133_v17, 0.0  ;;  %v3485_v51 = vld [vmem:[%s4641_s15 + $0x2d0] sm:$0xff] }
 0x7fa   :  { %v1269_v10 = vmax.f32 %v1093_v3, 0.0  ;;  %v1270_v11 = vmax.f32 %v1107_v4, 0.0  ;;  %2466 = vmatpush.bf16.msra.mxu2 %v3481_v60  ;;  %2480 = vmatpush.bf16.msra.mxu3 %v3489_v61 }
 0x7fb   :  { %2440 = vmatpush.bf16.msra.mxu0 %v3463_v0  ;;  %2454 = vmatpush.bf16.msrb.mxu1 %v3471_v1  ;;  %v3476_v0 = vld [vmem:[%s4641_s15 + $0x288] sm:$0xff] }
 0x7fc   :  { %v1285_v14 = vpack.c.bf16 %v1269_v10, %v1253_v7  ;;  %v1286_v15 = vpack.c.bf16 %v1270_v11, %v1254_v8  ;;  %v3484_v1 = vld [vmem:[%s4641_s15 + $0x2c8] sm:$0xff]  ;;  %v3497_v7 = vld [vmem:[%s4641_s15 + $0x330] sm:$0xff] }
 0x7fd   :  { %v3505_v8 = vld [vmem:[%s4641_s15 + $0x370] sm:$0xff] }
 0x7fe   :  { %2467 = vmatpush.bf16.msra.mxu2 %v3480_v12  ;;  %2481 = vmatpush.bf16.msra.mxu3 %v3488_v13  ;;  %v1120_v62 = vpop.f32.mrf.mxu2  ;;  %v1134_v18 = vpop.f32.mrf.mxu3  ;;  %v3475_v12 = vld [vmem:[%s4641_s15 + $0x280] sm:$0xff] }
 0x7ff   :  { %v1121_v27 = vadd.f32 %v1120_v62, %v836_v5  ;;  %v1135_v28 = vadd.f32 %v1134_v18, %v837_v6  ;;  %2389 = vmatmul.bf16.vlgmr.msrb.gmra.mxu0 %v1285_v14  ;;  %2403 = vmatmul.bf16.vlgmr.msra.gmra.mxu1 %v1286_v15  ;;  %v1146_v31 = vpop.f32.mrf.mxu0  ;;  %v1160_v32 = vpop.f32.mrf.mxu1  ;;  %v3483_v13 = vld [vmem:[%s4641_s15 + $0x2c0] sm:$0xff] }
 0x800   :  { %2441 = vmatpush.bf16.msra.mxu0 %v3462_v9  ;;  %2455 = vmatpush.bf16.msrb.mxu1 %v3470_v25  ;;  %v1147_v38 = vadd.f32 %v1146_v31, %v838_v40  ;;  %v1161_v47 = vadd.f32 %v1160_v32, %v839_v41  ;;  %v3514_v9 = vld [vmem:[%s4641_s15 + $0x3b8] sm:$0xff]  ;;  %v3513_v31 = vld [vmem:[%s4641_s15 + $0x3b0] sm:$0xff] }
 0x801   :  { %v1271_v37 = vmax.f32 %v1121_v27, 0.0  ;;  %v1272_v39 = vmax.f32 %v1135_v28, 0.0  ;;  %v3522_v25 = vld [vmem:[%s4641_s15 + $0x3f8] sm:$0xff]  ;;  %v3521_v32 = vld [vmem:[%s4641_s15 + $0x3f0] sm:$0xff] }
 0x802   :  { %2468 = vmatpush.bf16.msra.mxu2 %v3479_v20  ;;  %2482 = vmatpush.bf16.msra.mxu3 %v3487_v2  ;;  %v1257_v60 = vmax.f32 %v1147_v38, 0.0  ;;  %v1258_v61 = vmax.f32 %v1161_v47, 0.0  ;;  %v3496_v20 = vld [vmem:[%s4641_s15 + $0x328] sm:$0xff] }
 0x803   :  { %v1287_v34 = vpack.c.bf16 %v1271_v37, %v1255_v35  ;;  %v1288_v44 = vpack.c.bf16 %v1272_v39, %v1256_v36  ;;  %v3504_v2 = vld [vmem:[%s4641_s15 + $0x368] sm:$0xff]  ;;  %v3495_v35 = vld [vmem:[%s4641_s15 + $0x320] sm:$0xff] }
 0x804   :  { %2442 = vmatpush.bf16.msra.mxu0 %v3461_v33  ;;  %2456 = vmatpush.bf16.msrb.mxu1 %v3469_v30  ;;  %v3503_v36 = vld [vmem:[%s4641_s15 + $0x360] sm:$0xff]  ;;  %v3512_v37 = vld [vmem:[%s4641_s15 + $0x3a8] sm:$0xff] }
 0x805   :  { %2417 = vmatmul.bf16.vlgmr.msrb.gmra.mxu2 %v1287_v34  ;;  %2431 = vmatmul.bf16.vlgmr.msrb.gmra.mxu3 %v1288_v44  ;;  %v3520_v39 = vld [vmem:[%s4641_s15 + $0x3e8] sm:$0xff]  ;;  %v3511_v34 = vld [vmem:[%s4641_s15 + $0x3a0] sm:$0xff] }
 0x806   :  { %2469 = vmatpush.bf16.msra.mxu2 %v3478_v42  ;;  %2483 = vmatpush.bf16.msra.mxu3 %v3486_v43  ;;  %v1174_v48 = vpop.f32.mrf.mxu2  ;;  %v1188_v49 = vpop.f32.mrf.mxu3  ;;  %v3519_v44 = vld [vmem:[%s4641_s15 + $0x3e0] sm:$0xff] }
 0x807   :  { %v1148_v52 = vpop.f32.mrf.mxu0  ;;  %v1162_v21 = vpop.f32.mrf.mxu1  ;;  %v1175_v5 = vadd.f32 %v1174_v48, %v840_v57  ;;  %v1189_v6 = vadd.f32 %v1188_v49, %v841_v58  ;;  %v3510_v48 = vld [vmem:[%s4641_s15 + $0x398] sm:$0xff] }
 0x808   :  { %2443 = vmatpush.bf16.msra.mxu0 %v3460_v45  ;;  %2457 = vmatpush.bf16.msrb.mxu1 %v3468_v46  ;;  %v1149_v53 = vadd.f32 %v1148_v52, %v838_v40  ;;  %v1163_v54 = vadd.f32 %v1162_v21, %v839_v41  ;;  %v3494_v40 = vld [vmem:[%s4641_s15 + $0x318] sm:$0xff]  ;;  %v3493_v45 = vld [vmem:[%s4641_s15 + $0x310] sm:$0xff]  ;;  %v3492_v52 = vld [vmem:[%s4641_s15 + $0x308] sm:$0xff] }
 0x809   :  { %v1259_v16 = vmax.f32 %v1175_v5, 0.0  ;;  %v1260_v17 = vmax.f32 %v1189_v6, 0.0  ;;  %v3502_v41 = vld [vmem:[%s4641_s15 + $0x358] sm:$0xff]  ;;  %v3501_v46 = vld [vmem:[%s4641_s15 + $0x350] sm:$0xff]  ;;  %v3500_v21 = vld [vmem:[%s4641_s15 + $0x348] sm:$0xff] }
 0x80a   :  { %v1273_v23 = vmax.f32 %v1149_v53, 0.0  ;;  %v1274_v63 = vmax.f32 %v1163_v54, 0.0  ;;  %2470 = vmatpush.bf16.msra.mxu2 %v3477_v50  ;;  %2484 = vmatpush.bf16.msra.mxu3 %v3485_v51  ;;  %v3518_v49 = vld [vmem:[%s4641_s15 + $0x3d8] sm:$0xff]  ;;  %v842_v50 = vperm.slane %v4437_v29, 4  ;;  %v843_v51 = vperm.slane %v4437_v29, 5 }
 0x80c   :  { %v1289_v3 = vpack.c.bf16 %v1273_v23, %v1257_v60  ;;  %v1290_v4 = vpack.c.bf16 %v1274_v63, %v1258_v61  ;;  %2444 = vmatpush.bf16.msra.mxu0 %v3459_v55  ;;  %2458 = vmatpush.bf16.msrb.mxu1 %v3467_v56  ;;  %v3509_v55 = vld [vmem:[%s4641_s15 + $0x390] sm:$0xff]  ;;  %v3491_v60 = vld [vmem:[%s4641_s15 + $0x300] sm:$0xff]  ;;  %v844_v23 = vperm.slane %v4437_v29, 6  ;;  %v845_v63 = vperm.slane %v4437_v29, 7 }
 0x80d   :  { %v3517_v56 = vld [vmem:[%s4641_s15 + $0x3d0] sm:$0xff]  ;;  %v3499_v61 = vld [vmem:[%s4641_s15 + $0x340] sm:$0xff] }
 0x80e   :  { %2471 = vmatpush.bf16.msra.mxu2 %v3476_v0  ;;  %2485 = vmatpush.bf16.msra.mxu3 %v3484_v1  ;;  %v1176_v10 = vpop.f32.mrf.mxu2  ;;  %v1190_v11 = vpop.f32.mrf.mxu3 }
 0x80f   :  { %v1177_v14 = vadd.f32 %v1176_v10, %v840_v57  ;;  %v1191_v15 = vadd.f32 %v1190_v11, %v841_v58  ;;  %2445 = vmatmul.bf16.vlgmr.msra.gmra.mxu0 %v1289_v3  ;;  %2459 = vmatmul.bf16.vlgmr.msrb.gmra.mxu1 %v1290_v4  ;;  %v1202_v33 = vpop.f32.mrf.mxu0  ;;  %v1216_v30 = vpop.f32.mrf.mxu1  ;;  %v3508_v3 = vld [vmem:[%s4641_s15 + $0x388] sm:$0xff] }
 0x810   :  { %2493 = vmatpush.bf16.msrb.mxu0 %v3498_v22  ;;  %2507 = vmatpush.bf16.msra.mxu1 %v3506_v59  ;;  %v1203_v57 = vadd.f32 %v1202_v33, %v842_v50  ;;  %v1217_v58 = vadd.f32 %v1216_v30, %v843_v51  ;;  %v3516_v4 = vld [vmem:[%s4641_s15 + $0x3c8] sm:$0xff] }
 0x811   :  { %v1275_v62 = vmax.f32 %v1177_v14, 0.0  ;;  %v1276_v18 = vmax.f32 %v1191_v15, 0.0  ;;  %v3515_v14 = vld [vmem:[%s4641_s15 + $0x3c0] sm:$0xff] }
 0x812   :  { %2472 = vmatpush.bf16.msra.mxu2 %v3475_v12  ;;  %2486 = vmatpush.bf16.msra.mxu3 %v3483_v13  ;;  %v1261_v5 = vmax.f32 %v1203_v57, 0.0  ;;  %v1262_v6 = vmax.f32 %v1217_v58, 0.0  ;;  %v3507_v13 = vld [vmem:[%s4641_s15 + $0x380] sm:$0xff] }
 0x813   :  { %v1291_v27 = vpack.c.bf16 %v1275_v62, %v1259_v16  ;;  %v1292_v28 = vpack.c.bf16 %v1276_v18, %v1260_v17 }
 0x814   :  { %2494 = vmatpush.bf16.msrb.mxu0 %v3497_v7  ;;  %2508 = vmatpush.bf16.msra.mxu1 %v3505_v8 }
 0x815   :  { %2473 = vmatmul.bf16.vlgmr.msra.gmra.mxu2 %v1291_v27  ;;  %2487 = vmatmul.bf16.vlgmr.msra.gmra.mxu3 %v1292_v28 }
 0x816   :  { %2521 = vmatpush.bf16.msrb.mxu2 %v3514_v9  ;;  %2535 = vmatpush.bf16.msrb.mxu3 %v3522_v25  ;;  %v1230_v42 = vpop.f32.mrf.mxu2  ;;  %v1244_v43 = vpop.f32.mrf.mxu3 }
 0x817   :  { %v1204_v38 = vpop.f32.mrf.mxu0  ;;  %v1218_v47 = vpop.f32.mrf.mxu1  ;;  %v1231_v10 = vadd.f32 %v1230_v42, %v844_v23  ;;  %v1245_v29 = vadd.f32 %v1244_v43, %v845_v63 }
 0x818   :  { %2495 = vmatpush.bf16.msrb.mxu0 %v3496_v20  ;;  %2509 = vmatpush.bf16.msra.mxu1 %v3504_v2  ;;  %v1205_v53 = vadd.f32 %v1204_v38, %v842_v50  ;;  %v1219_v54 = vadd.f32 %v1218_v47, %v843_v51 }
 0x819   :  { %v1263_v25 = vmax.f32 %v1231_v10, 0.0  ;;  %v1264_v16 = vmax.f32 %v1245_v29, 0.0 }
 0x81a   :  { %2522 = vmatpush.bf16.msrb.mxu2 %v3513_v31  ;;  %2536 = vmatpush.bf16.msrb.mxu3 %v3521_v32  ;;  %v1277_v0 = vmax.f32 %v1205_v53, 0.0  ;;  %v1278_v1 = vmax.f32 %v1219_v54, 0.0  ;;  %v3562_v32 = vld [vmem:[%s4642_s16] ss:$0 sm:$0xff] }
 0x81c   :  { %2496 = vmatpush.bf16.msrb.mxu0 %v3495_v35  ;;  %2510 = vmatpush.bf16.msra.mxu1 %v3503_v36  ;;  %v1293_v11 = vpack.c.bf16 %v1277_v0, %v1261_v5  ;;  %v1294_v12 = vpack.c.bf16 %v1278_v1, %v1262_v6 }
 0x81e   :  { %2523 = vmatpush.bf16.msrb.mxu2 %v3512_v37  ;;  %2537 = vmatpush.bf16.msrb.mxu3 %v3520_v39  ;;  %v1232_v22 = vpop.f32.mrf.mxu2  ;;  %v1246_v59 = vpop.f32.mrf.mxu3 }
 0x81f   :  { %v1233_v7 = vadd.f32 %v1232_v22, %v844_v23  ;;  %v1247_v8 = vadd.f32 %v1246_v59, %v845_v63 }
 0x820   :  { %2497 = vmatpush.bf16.msrb.mxu0 %v3494_v40  ;;  %2511 = vmatpush.bf16.msra.mxu1 %v3502_v41 }
 0x821   :  { %v1279_v15 = vmax.f32 %v1233_v7, 0.0  ;;  %v1280_v9 = vmax.f32 %v1247_v8, 0.0 }
 0x822   :  { %2524 = vmatpush.bf16.msrb.mxu2 %v3511_v34  ;;  %2538 = vmatpush.bf16.msrb.mxu3 %v3519_v44 }
 0x823   :  { %v1295_v17 = vpack.c.bf16 %v1279_v15, %v1263_v25  ;;  %v1296_v62 = vpack.c.bf16 %v1280_v9, %v1264_v16 }
 0x824   :  { %2498 = vmatpush.bf16.msrb.mxu0 %v3493_v45  ;;  %2512 = vmatpush.bf16.msra.mxu1 %v3501_v46 }
 0x826   :  { %2525 = vmatpush.bf16.msrb.mxu2 %v3510_v48  ;;  %2539 = vmatpush.bf16.msrb.mxu3 %v3518_v49 }
 0x828   :  { %2499 = vmatpush.bf16.msrb.mxu0 %v3492_v52  ;;  %2513 = vmatpush.bf16.msra.mxu1 %v3500_v21 }
 0x82a   :  { %2526 = vmatpush.bf16.msrb.mxu2 %v3509_v55  ;;  %2540 = vmatpush.bf16.msrb.mxu3 %v3517_v56 }
 0x82c   :  { %2500 = vmatpush.bf16.msrb.mxu0 %v3491_v60  ;;  %2514 = vmatpush.bf16.msra.mxu1 %v3499_v61 }
 0x82e   :  { %2527 = vmatpush.bf16.msrb.mxu2 %v3508_v3  ;;  %2541 = vmatpush.bf16.msrb.mxu3 %v3516_v4 }
 0x82f   :  { %2501 = vmatmul.bf16.vlgmr.msrb.gmra.mxu0 %v1293_v11  ;;  %2515 = vmatmul.bf16.vlgmr.msra.gmra.mxu1 %v1294_v12 }
 0x832   :  { %2528 = vmatpush.bf16.msrb.mxu2 %v3507_v13  ;;  %2542 = vmatpush.bf16.msrb.mxu3 %v3515_v14 }
 0x835   :  { %2529 = vmatmul.bf16.vlgmr.msrb.gmra.mxu2 %v1295_v17  ;;  %2543 = vmatmul.bf16.vlgmr.msrb.gmra.mxu3 %v1296_v62 }
 0x86b   :  { %v2334_v18 = vpop.f32.mrf.mxu0  ;;  %v2348_v20 = vpop.f32.mrf.mxu1 }
 0x86c   :  { %v2335_v36 = vadd.f32 %v3562_v32, %v2334_v18 }
 0x86e   :  { %v2349_v39 = vadd.f32 %v2348_v20, %v2335_v36 }
 0x873   :  { %v2336_v2 = vpop.f32.mrf.mxu0  ;;  %v2350_v31 = vpop.f32.mrf.mxu1 }
 0x874   :  { %v2337_v34 = vadd.f32 %v3562_v32, %v2336_v2 }
 0x876   :  { %v2351_v45 = vadd.f32 %v2350_v31, %v2337_v34  ;;  %v2609_v34 = vld [vmem:[%s4647_s19 + $0x10] sm:$0xff] }
 0x878   :  { %v2362_v27 = vpop.f32.mrf.mxu2  ;;  %v2376_v28 = vpop.f32.mrf.mxu3 }
 0x879   :  { %v2363_v40 = vadd.f32 %v2362_v27, %v2349_v39 }
 0x87b   :  { %v2377_v44 = vadd.f32 %v2376_v28, %v2363_v40 }
 0x87c   :  { %v2390_v33 = vpop.f32.mrf.mxu0  ;;  %v2404_v37 = vpop.f32.mrf.mxu1 }
 0x87d   :  { %v2391_v38 = vadd.f32 %v2390_v33, %v2377_v44  ;;  %v2608_v44 = vld [vmem:[%s4647_s19 + $0x8] sm:$0xff] }
 0x87f   :  { %v2405_v51 = vadd.f32 %v2404_v37, %v2391_v38 }
 0x880   :  { %v2364_v30 = vpop.f32.mrf.mxu2  ;;  %v2378_v35 = vpop.f32.mrf.mxu3 }
 0x881   :  { %v2365_v47 = vadd.f32 %v2364_v30, %v2351_v45  ;;  %v2607_v45 = vld [vmem:[%s4647_s19] sm:$0xff] }
 0x883   :  { %v2379_v52 = vadd.f32 %v2378_v35, %v2365_v47 }
 0x884   :  { %v2392_v41 = vpop.f32.mrf.mxu0  ;;  %v2406_v46 = vpop.f32.mrf.mxu1 }
 0x885   :  { %v2393_v53 = vadd.f32 %v2392_v41, %v2379_v52 }
 0x887   :  { %v2407_v56 = vadd.f32 %v2406_v46, %v2393_v53 }
 0x888   :  { %v2418_v42 = vpop.f32.mrf.mxu2  ;;  %v2432_v43 = vpop.f32.mrf.mxu3 }
 0x889   :  { %v2419_v21 = vadd.f32 %v2418_v42, %v2405_v51 }
 0x88b   :  { %v2433_v55 = vadd.f32 %v2432_v43, %v2419_v21 }
 0x88c   :  { %v2446_v48 = vpop.f32.mrf.mxu0  ;;  %v2460_v54 = vpop.f32.mrf.mxu1 }
 0x88d   :  { %v2447_v59 = vadd.f32 %v2446_v48, %v2433_v55 }
 0x88f   :  { %v2461_v61 = vadd.f32 %v2460_v54, %v2447_v59 }
 0x890   :  { %v2420_v49 = vpop.f32.mrf.mxu2  ;;  %v2434_v50 = vpop.f32.mrf.mxu3 }
 0x891   :  { %v2421_v60 = vadd.f32 %v2420_v49, %v2407_v56 }
 0x893   :  { %v2435_v23 = vadd.f32 %v2434_v50, %v2421_v60  ;;  %v3564_v60 = vld [vmem:[%s4645_s18] ss:$0 sm:$0xff] }
 0x894   :  { %v2448_v57 = vpop.f32.mrf.mxu0  ;;  %v2462_v63 = vpop.f32.mrf.mxu1 }
 0x895   :  { %v2449_v3 = vadd.f32 %v2448_v57, %v2435_v23 }
 0x897   :  { %v2463_v7 = vadd.f32 %v2462_v63, %v2449_v3 }
 0x898   :  { %v2474_v58 = vpop.f32.mrf.mxu2  ;;  %v2488_v22 = vpop.f32.mrf.mxu3 }
 0x899   :  { %v2475_v0 = vadd.f32 %v2474_v58, %v2461_v61  ;;  %v3563_v58 = vld [vmem:[%s4644_s17] ss:$0 sm:$0xff] }
 0x89b   :  { %v2489_v6 = vadd.f32 %v2488_v22, %v2475_v0 }
 0x8a0   :  { %v2476_v4 = vpop.f32.mrf.mxu2  ;;  %v2490_v5 = vpop.f32.mrf.mxu3 }
 0x8a1   :  { %v2477_v29 = vadd.f32 %v2476_v4, %v2463_v7  ;;  %v3565_v7 = vld [vmem:[%s4646_s20] ss:$0 sm:$0xff] }
 0x8a3   :  { %v2491_v15 = vadd.f32 %v2490_v5, %v2477_v29  ;;  %v2644_v29 = vlaneseq }
 0x8ac   :  { %v2502_v1 = vpop.f32.mrf.mxu0  ;;  %v2516_v10 = vpop.f32.mrf.mxu1 }
 0x8ad   :  { %v2503_v8 = vadd.f32 %v2502_v1, %v2489_v6 }
 0x8af   :  { %v2517_v11 = vadd.f32 %v2516_v10, %v2503_v8 }
 0x8b4   :  { %v2504_v12 = vpop.f32.mrf.mxu0  ;;  %v2518_v62 = vpop.f32.mrf.mxu1 }
 0x8b5   :  { %v2505_v25 = vadd.f32 %v2504_v12, %v2491_v15  ;;  %v2645_v12 = vand.u32 127, %v2644_v29 }
 0x8b7   :  { %v2519_v18 = vadd.f32 %v2518_v62, %v2505_v25  ;;  %vm2647_vm5 = vcmp.lt.s32.totalorder %v2645_v12, 4  ;;  %vm2646_vm6 = vcmp.lt.s32.totalorder %v2645_v12, 2 }
 0x8b8   :  { %v2530_v13 = vpop.f32.mrf.mxu2  ;;  %v2544_v14 = vpop.f32.mrf.mxu3 }
 0x8b9   :  { %v2531_v9 = vadd.f32 %v2530_v13, %v2517_v11 }
 0x8bb   :  { %v2545_v16 = vadd.f32 %v2544_v14, %v2531_v9 }
 0x8bd   :  { %v2549_v17 = vadd.f32 %v2545_v16, %v4054_v24 }
 0x8bf   :  { %v2551_v20 = vsel %vm174_vm4, %v2549_v17, 0.0 }
 0x8c0   :  { %v2532_v2 = vpop.f32.mrf.mxu2  ;;  %2552 = vadd.xlane.f32.xlu2 %v2551_v20  ;;  %v2546_v28 = vpop.f32.mrf.mxu3 }
 0x8c1   :  { %v2533_v27 = vadd.f32 %v2532_v2, %v2519_v18 }
 0x8c3   :  { %v2547_v31 = vadd.f32 %v2546_v28, %v2533_v27 }
 0x8c5   :  { %v2550_v32 = vadd.f32 %v2547_v31, %v4056_v26  ;;  %v2610_v26 = vld [vmem:[%s4647_s19 + $0x18] sm:$0xff] }
 0x8c6   :  { %2633 = vmatpush.msra.mxu0 %v2610_v26 }
 0x8c7   :  { %v2554_v33 = vsel %vm174_vm4, %v2550_v32, 0.0 }
 0x8c8   :  { %2555 = vadd.xlane.f32.xlu2 %v2554_v33  ;;  %2634 = vmatpush.msra.mxu0 %v2609_v34 }
 0x8ca   :  { %2635 = vmatpush.msra.mxu0 %v2608_v44 }
 0x8cc   :  { %2636 = vmatpush.msra.mxu0 %v2607_v45 }
 0x933   :  { %v2553_v30 = vpop.xlane.xlu2 %2552 }
 0x934   :  { %v2557_v35 = vmul.f32 %v2553_v30, %v3914_v19 }
 0x936   :  { %v2559_v36 = vsub.f32 %v2549_v17, %v2557_v35 }
 0x938   :  { %v2561_v37 = vmul.f32 %v2559_v36, %v2559_v36 }
 0x93a   :  { %v2563_v24 = vsel %vm174_vm4, %v2561_v37, 0.0 }
 0x93b   :  { %2564 = vadd.xlane.f32.xlu2 %v2563_v24  ;;  %v2556_v39 = vpop.xlane.xlu2 %2555 }
 0x93c   :  { %v2558_v40 = vmul.f32 %v2556_v39, %v3914_v19 }
 0x93e   :  { %v2560_v41 = vsub.f32 %v2550_v32, %v2558_v40 }
 0x940   :  { %v2562_v42 = vmul.f32 %v2560_v41, %v2560_v41 }
 0x942   :  { %v2566_v43 = vsel %vm174_vm4, %v2562_v42, 0.0 }
 0x943   :  { %2567 = vadd.xlane.f32.xlu0 %v2566_v43 }
 0x9ae   :  { %v2565_v46 = vpop.xlane.xlu2 %2564 }
 0x9af   :  { %v2569_v38 = vmul.f32 %v2565_v46, %v3914_v19 }
 0x9b1   :  { %v2571_v47 = vadd.f32 1e-05, %v2569_v38 }
 0x9b3   :  { %3604 = vrsqrt.f32 %v2571_v47  ;;  %vm2579_vm15 = vweird.f32 %v2571_v47 }
 0x9b6   :  { %v2568_v48 = vpop.xlane.xlu0 %2567 }
 0x9b7   :  { %v2570_v49 = vmul.f32 %v2568_v48, %v3914_v19 }
 0x9b9   :  { %v3605_v50 = vpop.eup %3604  ;;  %v2572_v51 = vadd.f32 1e-05, %v2570_v49 }
 0x9ba   :  { %v2574_v52 = vmul.f32 %v3605_v50, %v2571_v47  ;;  %vm2580_vm14 = vweird.f32 %v3605_v50 }
 0x9bb   :  { %3606 = vrsqrt.f32 %v2572_v51  ;;  %vm2581_vm0 = vmor %vm2579_vm15, %vm2580_vm14  ;;  %vm2589_vm2 = vweird.f32 %v2572_v51 }
 0x9bc   :  { %v2575_v21 = vmul.f32 %v3605_v50, %v2574_v52 }
 0x9be   :  { %v2576_v53 = vmul.f32 0.5, %v2575_v21 }
 0x9c0   :  { %v2577_v54 = vsub.f32 1.5, %v2576_v53 }
 0x9c1   :  { %v3607_v55 = vpop.eup %3606 }
 0x9c2   :  { %v2578_v56 = vmul.f32 %v3605_v50, %v2577_v54  ;;  %v2584_v57 = vmul.f32 %v3607_v55, %v2572_v51  ;;  %vm2590_vm1 = vweird.f32 %v3607_v55 }
 0x9c3   :  { %vm2591_vm3 = vmor %vm2589_vm2, %vm2590_vm1 }
 0x9c4   :  { %v2582_v22 = vsel %vm2581_vm0, %v3605_v50, %v2578_v56  ;;  %v2585_v59 = vmul.f32 %v3607_v55, %v2584_v57 }
 0x9c5   :  { %v2593_v19 = vmul.f32 %v2582_v22, %v2559_v36 }
 0x9c6   :  { %v2586_v61 = vmul.f32 0.5, %v2585_v59 }
 0x9c7   :  { %v2599_v23 = vmul.f32 %v3563_v58, %v2593_v19 }
 0x9c8   :  { %v2587_v63 = vsub.f32 1.5, %v2586_v61 }
 0x9c9   :  { %v2605_v0 = vadd.f32 %v3564_v60, %v2599_v23 }
 0x9ca   :  { %v2588_v1 = vmul.f32 %v3607_v55, %v2587_v63 }
 0x9cb   :  { %3361 = vmatmul.msk.f32.vlgmr.msra.gmra.mxu0 %vm174_vm4, %v2605_v0 }
 0x9cc   :  { %v2592_v3 = vsel %vm2591_vm3, %v3607_v55, %v2588_v1 }
 0x9cd   :  { %v2594_v4 = vmul.f32 %v2592_v3, %v2560_v41 }
 0x9cf   :  { %v2600_v5 = vmul.f32 %v3563_v58, %v2594_v4 }
 0x9d1   :  { %v2606_v6 = vadd.f32 %v3564_v60, %v2600_v5 }
 0x9d3   :  { %3362 = vmatmul.msk.f32.gmra.mxu0 %vm174_vm4, %v2606_v6 }
 0xa48   :  { %v2638_v8 = vpop.f32.mrf.mxu0 }
 0xa49   :  { %v2639_v10 = vadd.f32 %v3565_v7, %v2638_v8 }
 0xa4b   :  { %v2648_v11 = vmul.f32 1.442695, %v2639_v10  ;;  %3608 = vtanh.f32 %v2639_v10 }
 0xa4d   :  { %3610 = vpow2.f32 %v2648_v11 }
 0xa50   :  { %v2641_v13 = vpop.f32.mrf.mxu0 }
 0xa51   :  { %v2642_v14 = vadd.f32 %v3565_v7, %v2641_v13  ;;  %v3609_v15 = vpop.eup %3608 }
 0xa53   :  { %v3611_v9 = vpop.eup %3610  ;;  %v2650_v25 = vmul.f32 1.442695, %v2642_v14  ;;  %3612 = vtanh.f32 %v2642_v14 }
 0xa54   :  { %v2654_v16 = vsel %vm2647_vm5, %v3611_v9, %v3609_v15 }
 0xa55   :  { %v2656_v17 = vsel %vm2646_vm6, %v2639_v10, %v2654_v16  ;;  %3614 = vpow2.f32 %v2650_v25 }
 0xa56   :  { %2658 = vst [vmem:[%s4648_s21] sm:$0xff] %v2656_v17 }
 0xa59   :  { %v3613_v62 = vpop.eup %3612 }
 0xa5b   :  { %v3615_v18 = vpop.eup %3614 }
 0xa5c   :  { %v2655_v20 = vsel %vm2647_vm5, %v3615_v18, %v3613_v62 }
 0xa5d   :  { %v2657_v2 = vsel %vm2646_vm6, %v2642_v14, %v2655_v20 }
 0xa5e   :  { %2659 = vst [vmem:[%s4648_s21 + $0x8] sm:$0xff] %v2657_v2 }

</bundles_post_ra>
